<compile_context>
chip_gen: v7x
topology: tpu7x:2x2x1
jax: 0.10.0
libtpu: 0.0.40
codegen_flags: <defaults>
</compile_context>

<pallas_src>
import math
from functools import partial

import jax
import jax.numpy as jnp
from jax.experimental import pallas as pl
from jax.experimental.pallas import tpu as pltpu


# ----------------------------------------------------------------------------- helpers

def _layer_norm(y, gamma, beta, eps):
    mu = jnp.mean(y, axis=-1, keepdims=True)
    var = jnp.mean(jnp.square(y - mu), axis=-1, keepdims=True)
    return (y - mu) * jax.lax.rsqrt(var + eps) * gamma + beta


def get_relative_embeddings(emb, length, window_size):
    """Mirror of MultiHeadAttention._get_relative_embeddings (heads_share=True).

    emb: (1, 2*window_size+1, kc)  ->  (2*length-1, kc)
    """
    pad_length = max(length - (window_size + 1), 0)
    slice_start = max(window_size + 1 - length, 0)
    padded = jnp.pad(emb, ((0, 0), (pad_length, pad_length), (0, 0)))
    return padded[0, slice_start:slice_start + 2 * length - 1]


def _shear(x, length, direction):
    """Per-row cyclic roll of the last axis (size 2*length-1).

    Row i (second-to-last axis) is rolled by direction*(length-1-i):
      direction=+1 (left):  out[..., i, j] = x[..., i, (j + (length-1-i)) % R]
      direction=-1 (right): out[..., i, j] = x[..., i, (j - (length-1-i)) % R]

    This is the rel<->abs position "skew" of relative attention.  Implemented with
    ceil(log2(length)) static rolls (slice+concat along lanes) + per-row selects so
    it lowers to plain lane shifts / VPU selects (no gather, no reshape).
    """
    R = x.shape[-1]
    row = jax.lax.broadcasted_iota(jnp.int32, x.shape, dimension=x.ndim - 2)
    shift = (length - 1) - row
    nbits = max(1, (length - 1).bit_length())
    for b in range(nbits):
        step = 1 << b
        if direction > 0:   # roll left by `step`
            rolled = jnp.concatenate([x[..., step:], x[..., :step]], axis=-1)
        else:               # roll right by `step`
            rolled = jnp.concatenate([x[..., R - step:], x[..., :R - step]], axis=-1)
        x = jnp.where((shift & step) != 0, rolled, x)
    return x


# ----------------------------------------------------------------------------- kernel

def encoder_kernel(
    x_ref, mcol_ref, mrow_ref,
    wqkv_ref, bqkv_ref, wo_ref, bo_ref, ek_ref, ev_ref,
    g1_ref, be1_ref, g2_ref, be2_ref,
    w1_ref, bf1_ref, w2_ref, bf2_ref,
    out_ref, h_ref,
    *, n_heads, k_channels, eps,
):
    f32 = jnp.float32
    bf16 = jnp.bfloat16
    H, kc = n_heads, k_channels
    T, C = h_ref.shape
    R = 2 * T - 1

    l = pl.program_id(1)

    @pl.when(l == 0)
    def _():
        # Encoder.forward: x = x * x_mask before the first layer.
        h_ref[...] = x_ref[0] * mcol_ref[0]

    x = h_ref[...]                                   # (T, C) f32 carried activation
    mcol = mcol_ref[0]                               # (T, 1)
    mrow = mrow_ref[0]                               # (1, T)
    valid = (mcol * mrow) != 0.0                     # (T, T) attn mask, built in-kernel

    # ---- fused QKV projection: one (T,C)@(C,3C) bf16 MXU matmul, f32 accum ----
    x_b = x.astype(bf16)
    qkv = jnp.dot(x_b, wqkv_ref[0], preferred_element_type=f32) + bqkv_ref[0]   # (T, 3C)

    def split_heads(base):                           # -> (H, T, kc)
        return jnp.stack(
            [qkv[:, base + h * kc: base + (h + 1) * kc] for h in range(H)], axis=0)

    scale = 1.0 / math.sqrt(kc)
    qh = (split_heads(0) * scale).astype(bf16)       # query pre-scaled (matches PyTorch)
    kh = split_heads(C).astype(bf16)
    vh = split_heads(2 * C).astype(bf16)

    # ---- attention scores, batched over heads (MXU) ----
    scores = jnp.einsum("htd,hsd->hts", qh, kh, preferred_element_type=f32)      # (H,T,T)

    # relative-position logits: (q*scale) @ E_k^T on the MXU, then rel->abs shear.
    ek = jnp.broadcast_to(ek_ref[0], (H, R, kc))                                 # bf16
    rel = jnp.einsum("htd,hrd->htr", qh, ek, preferred_element_type=f32)         # (H,T,R)
    scores = scores + _shear(rel, T, direction=1)[:, :, :T]

    # masked_fill(mask == 0, -1e4)
    scores = jnp.where(valid[None], scores, jnp.float32(-1e4))

    # softmax (dropout p=0 -> identity); divide on the EUP
    m = jnp.max(scores, axis=-1, keepdims=True)
    e = jnp.exp(scores - m)
    p = e * pl.reciprocal(jnp.sum(e, axis=-1, keepdims=True), approx=True)       # (H,T,T)

    o = jnp.einsum("hts,hsd->htd", p.astype(bf16), vh, preferred_element_type=f32)

    # relative-position values: abs->rel shear of p, then (T,2T-1)@(2T-1,kc) on the MXU.
    p_pad = jnp.concatenate([p, jnp.zeros((H, T, T - 1), f32)], axis=-1)         # (H,T,R)
    p_rel = _shear(p_pad, T, direction=-1).astype(bf16)
    ev = jnp.broadcast_to(ev_ref[0], (H, R, kc))
    o = o + jnp.einsum("htr,hrd->htd", p_rel, ev, preferred_element_type=f32)    # (H,T,kc)

    # output projection with heads folded via a batched matmul + head-sum (no lane concat)
    attn = jnp.sum(
        jnp.einsum("htd,hdc->htc", o.astype(bf16), wo_ref[0],
                   preferred_element_type=f32),
        axis=0) + bo_ref[0]                                                      # (T, C)

    # residual + LayerNorm 1
    h1 = _layer_norm(x + attn, g1_ref[0], be1_ref[0], eps)

    # FFN (Conv1d ks=1 -> matmul), activation=None -> relu, dropout p=0
    f = (h1 * mcol).astype(bf16)
    f = jnp.dot(f, w1_ref[0], preferred_element_type=f32) + bf1_ref[0]
    f = jnp.maximum(f, 0.0).astype(bf16)
    f = jnp.dot(f, w2_ref[0], preferred_element_type=f32) + bf2_ref[0]
    f = f * mcol

    # residual + LayerNorm 2 -> carried state for the next layer
    y = _layer_norm(h1 + f, g2_ref[0], be2_ref[0], eps)
    h_ref[...] = y

    @pl.when(l == pl.num_programs(1) - 1)
    def _():
        out_ref[0] = y * mcol        # final `return x * x_mask`


# ----------------------------------------------------------------------------- wrapper

def encoder_forward(x_btc, x_mask_bt, packed, *, n_heads, window_size, eps=1e-5):
    B, T, C = x_btc.shape
    L = packed["wqkv"].shape[0]
    kc = C // n_heads

    mcol = x_mask_bt[:, :, None].astype(jnp.float32)     # (B, T, 1)
    mrow = x_mask_bt[:, None, :].astype(jnp.float32)     # (B, 1, T)

    # length-sliced relative embeddings, (L, 2T-1, kc) — KBs instead of (T,T,kc).
    slice_rel = lambda e: get_relative_embeddings(e, T, window_size)
    ek = jax.vmap(slice_rel)(packed["emb_rel_k"]).astype(jnp.bfloat16)
    ev = jax.vmap(slice_rel)(packed["emb_rel_v"]).astype(jnp.bfloat16)

    weights = [packed["wqkv"], packed["bqkv"], packed["wo"], packed["bo"],
               ek, ev,
               packed["g1"], packed["be1"], packed["g2"], packed["be2"],
               packed["w1"], packed["bf1"], packed["w2"], packed["bf2"]]

    def lspec(arr):
        nd = arr.ndim
        return pl.BlockSpec((1,) + arr.shape[1:],
                            lambda b, l, _nd=nd: (l,) + (0,) * (_nd - 1))

    kernel = partial(encoder_kernel, n_heads=n_heads, k_channels=kc, eps=eps)

    return pl.pallas_call(
        kernel,
        out_shape=jax.ShapeDtypeStruct((B, T, C), jnp.float32),
        grid=(B, L),
        in_specs=[pl.BlockSpec((1, T, C), lambda b, l: (b, 0, 0)),   # x (layer 0 input)
                  pl.BlockSpec((1, T, 1), lambda b, l: (b, 0, 0)),   # mask column
                  pl.BlockSpec((1, 1, T), lambda b, l: (b, 0, 0))]   # mask row
                 + [lspec(w) for w in weights],
        out_specs=pl.BlockSpec((1, T, C), lambda b, l: (b, 0, 0)),
        scratch_shapes=[pltpu.VMEM((T, C), jnp.float32)],            # carried activation
        compiler_params=pltpu.CompilerParams(
            dimension_semantics=("parallel", "arbitrary"),
            # Explicit scoped-VMEM budget: demo working set is well under 2 MiB; this
            # cap is within every generation's scoped/physical limits.
            vmem_limit_bytes=32 * 1024 * 1024),
    )(x_btc.astype(jnp.float32), mcol, mrow, *weights)


# ----------------------------------------------------------------------------- params

def init_params(key, n_layers, C, F, n_heads, ws):
    kc = C // n_heads
    layers = []
    for l in range(n_layers):
        keys = jax.random.split(jax.random.fold_in(key, l), 16)

        def nrm(k, shape, scale):
            return scale * jax.random.normal(k, shape, jnp.float32)

        lp = dict(
            wq=nrm(keys[0], (C, C), 0.05), bq=nrm(keys[1], (1, C), 0.02),
            wk=nrm(keys[2], (C, C), 0.05), bk=nrm(keys[3], (1, C), 0.02),
            wv=nrm(keys[4], (C, C), 0.05), bv=nrm(keys[5], (1, C), 0.02),
            wo=nrm(keys[6], (C, C), 0.05), bo=nrm(keys[7], (1, C), 0.02),
            emb_rel_k=nrm(keys[8], (1, 2 * ws + 1, kc), kc ** -0.5),
            emb_rel_v=nrm(keys[9], (1, 2 * ws + 1, kc), kc ** -0.5),
            g1=1.0 + nrm(keys[10], (1, C), 0.05), be1=nrm(keys[11], (1, C), 0.05),
            g2=1.0 + nrm(keys[12], (1, C), 0.05), be2=nrm(keys[13], (1, C), 0.05),
            w1=nrm(keys[14], (C, F), 0.05), bf1=jnp.zeros((1, F), jnp.float32),
            w2=nrm(keys[15], (F, C), 0.05), bf2=jnp.zeros((1, C), jnp.float32),
        )
        layers.append(lp)
    return layers


def pack_params(layers, n_heads):
    """Stack per-layer params into (L, ...) arrays; fuse QKV; bf16 matmul weights."""
    L = len(layers)
    C = layers[0]["wq"].shape[0]
    kc = C // n_heads
    bf16 = jnp.bfloat16
    stack = lambda name: jnp.stack([lp[name] for lp in layers], axis=0)
    wqkv = jnp.concatenate([stack("wq"), stack("wk"), stack("wv")], axis=-1)   # (L,C,3C)
    bqkv = jnp.concatenate([stack("bq"), stack("bk"), stack("bv")], axis=-1)   # (L,1,3C)
    wo = stack("wo").reshape(L, n_heads, kc, C)                                # head-major rows
    return dict(
        wqkv=wqkv.astype(bf16), bqkv=bqkv,
        wo=wo.astype(bf16), bo=stack("bo"),
        emb_rel_k=stack("emb_rel_k"), emb_rel_v=stack("emb_rel_v"),
        g1=stack("g1"), be1=stack("be1"), g2=stack("g2"), be2=stack("be2"),
        w1=stack("w1").astype(bf16), bf1=stack("bf1"),
        w2=stack("w2").astype(bf16), bf2=stack("bf2"),
    )


# ----------------------------------------------------------------------------- pure-JAX reference (mirrors the PyTorch pad/reshape skew exactly, all f32)

def _rel_to_abs(x):
    B, H, T, _ = x.shape
    x = jnp.pad(x, ((0, 0), (0, 0), (0, 0), (0, 1)))
    x = x.reshape(B, H, T * 2 * T)
    x = jnp.pad(x, ((0, 0), (0, 0), (0, T - 1)))
    x = x.reshape(B, H, T + 1, 2 * T - 1)
    return x[:, :, :T, T - 1:]


def _abs_to_rel(x):
    B, H, T, _ = x.shape
    x = jnp.pad(x, ((0, 0), (0, 0), (0, 0), (0, T - 1)))
    x = x.reshape(B, H, T * (2 * T - 1))
    x = jnp.pad(x, ((0, 0), (0, 0), (T, 0)))
    x = x.reshape(B, H, T, 2 * T)
    return x[:, :, :, 1:]


def encoder_reference(x_btc, x_mask_bt, layers, *, n_heads, window_size, eps=1e-5):
    B, T, C = x_btc.shape
    kc = C // n_heads
    scale = kc ** -0.5
    mask = x_mask_bt[:, :, None]
    amask = mask * x_mask_bt[:, None, :]
    x = x_btc * mask
    for lp in layers:
        q = x @ lp["wq"] + lp["bq"]
        k = x @ lp["wk"] + lp["bk"]
        v = x @ lp["wv"] + lp["bv"]

        def split(a):
            return a.reshape(B, T, n_heads, kc).transpose(0, 2, 1, 3)

        qh, kh, vh = split(q) * scale, split(k), split(v)
        scores = jnp.einsum('bhtd,bhsd->bhts', qh, kh)
        ek = get_relative_embeddings(lp["emb_rel_k"], T, window_size)
        scores = scores + _rel_to_abs(jnp.einsum('bhtd,rd->bhtr', qh, ek))
        scores = jnp.where(amask[:, None] == 0, -1e4, scores)
        p = jax.nn.softmax(scores, axis=-1)
        out = jnp.einsum('bhts,bhsd->bhtd', p, vh)
        ev = get_relative_embeddings(lp["emb_rel_v"], T, window_size)
        out = out + jnp.einsum('bhtr,rd->bhtd', _abs_to_rel(p), ev)
        out = out.transpose(0, 2, 1, 3).reshape(B, T, C)
        attn = out @ lp["wo"] + lp["bo"]
        h1 = _layer_norm(x + attn, lp["g1"], lp["be1"], eps)
        f = h1 * mask
        f = jnp.maximum(f @ lp["w1"] + lp["bf1"], 0.0)
        f = (f @ lp["w2"] + lp["bf2"]) * mask
        x = _layer_norm(h1 + f, lp["g2"], lp["be2"], eps)
    return x * mask


# ----------------------------------------------------------------------------- main

if __name__ == "__main__":
    B, T, C, F, H, L, WS = 2, 16, 64, 128, 4, 2, 4   # batch, seq, hidden, filter, heads, layers, window
    key = jax.random.PRNGKey(0)
    kx, kp = jax.random.split(key)

    x = jax.random.normal(kx, (B, T, C), jnp.float32)            # (B, T, C) layout
    lengths = jnp.array([T, T - 5], jnp.int32)
    x_mask = (jnp.arange(T)[None, :] < lengths[:, None]).astype(jnp.float32)   # (B, T)

    layers = init_params(kp, L, C, F, H, WS)
    packed = pack_params(layers, H)

    fwd = jax.jit(partial(encoder_forward, n_heads=H, window_size=WS))
    out = jax.block_until_ready(fwd(x, x_mask, packed))

    ref = encoder_reference(x, x_mask, layers, n_heads=H, window_size=WS)
    err = float(jnp.max(jnp.abs(out - ref)))
    assert out.shape == (B, T, C)
    # bf16 MXU matmuls + approx-reciprocal softmax in the kernel vs. an all-f32 reference.
    assert err < 1e-1, f"max abs error {err}"
    print("KERNEL_OK")
</pallas_src>

<mosaic_0001>
module attributes {stable_mosaic.version = 11 : i64} {
  func.func @encoder_kernel(%arg0: i32, %arg1: i32, %arg2: memref<1x16x64xf32, #tpu.memory_space<vmem>>, %arg3: memref<1x16x1xf32, #tpu.memory_space<vmem>>, %arg4: memref<1x1x16xf32, #tpu.memory_space<vmem>>, %arg5: memref<1x64x192xbf16, #tpu.memory_space<vmem>>, %arg6: memref<1x1x192xf32, #tpu.memory_space<vmem>>, %arg7: memref<1x4x16x64xbf16, #tpu.memory_space<vmem>>, %arg8: memref<1x1x64xf32, #tpu.memory_space<vmem>>, %arg9: memref<1x31x16xbf16, #tpu.memory_space<vmem>>, %arg10: memref<1x31x16xbf16, #tpu.memory_space<vmem>>, %arg11: memref<1x1x64xf32, #tpu.memory_space<vmem>>, %arg12: memref<1x1x64xf32, #tpu.memory_space<vmem>>, %arg13: memref<1x1x64xf32, #tpu.memory_space<vmem>>, %arg14: memref<1x1x64xf32, #tpu.memory_space<vmem>>, %arg15: memref<1x64x128xbf16, #tpu.memory_space<vmem>>, %arg16: memref<1x1x128xf32, #tpu.memory_space<vmem>>, %arg17: memref<1x128x64xbf16, #tpu.memory_space<vmem>>, %arg18: memref<1x1x64xf32, #tpu.memory_space<vmem>>, %arg19: memref<1x16x64xf32, #tpu.memory_space<vmem>>, %arg20: memref<16x64xf32, #tpu.memory_space<vmem>>) attributes {dimension_semantics = [#tpu.dimension_semantics<parallel>, #tpu.dimension_semantics<arbitrary>], iteration_bounds = array<i64: 2, 2>, scalar_prefetch = 0 : i64, scratch_operands = 1 : i64, tpu.core_type = #tpu.core_type<tc>, window_params = [{transform_indices = @transform_0, window_bounds = array<i64: 1, 16, 64>}, {transform_indices = @transform_1, window_bounds = array<i64: 1, 16, 1>}, {transform_indices = @transform_2, window_bounds = array<i64: 1, 1, 16>}, {transform_indices = @transform_3, window_bounds = array<i64: 1, 64, 192>}, {transform_indices = @transform_4, window_bounds = array<i64: 1, 1, 192>}, {transform_indices = @transform_5, window_bounds = array<i64: 1, 4, 16, 64>}, {transform_indices = @transform_6, window_bounds = array<i64: 1, 1, 64>}, {transform_indices = @transform_7, window_bounds = array<i64: 1, 31, 16>}, {transform_indices = @transform_8, window_bounds = array<i64: 1, 31, 16>}, {transform_indices = @transform_9, window_bounds = array<i64: 1, 1, 64>}, {transform_indices = @transform_10, window_bounds = array<i64: 1, 1, 64>}, {transform_indices = @transform_11, window_bounds = array<i64: 1, 1, 64>}, {transform_indices = @transform_12, window_bounds = array<i64: 1, 1, 64>}, {transform_indices = @transform_13, window_bounds = array<i64: 1, 64, 128>}, {transform_indices = @transform_14, window_bounds = array<i64: 1, 1, 128>}, {transform_indices = @transform_15, window_bounds = array<i64: 1, 128, 64>}, {transform_indices = @transform_16, window_bounds = array<i64: 1, 1, 64>}, {transform_indices = @transform_17, window_bounds = array<i64: 1, 16, 64>}]} {
    %c0_i32 = arith.constant 0 : i32
    %0 = arith.cmpi eq, %arg1, %c0_i32 : i32
    %1 = arith.extui %0 : i1 to i32
    %c0_i32_0 = arith.constant 0 : i32
    %2 = arith.cmpi ne, %1, %c0_i32_0 : i32
    scf.if %2 {
      %c0_93 = arith.constant 0 : index
      %c0_94 = arith.constant 0 : index
      %c0_95 = arith.constant 0 : index
      %246 = vector.load %arg2[%c0_93, %c0_94, %c0_95] : memref<1x16x64xf32, #tpu.memory_space<vmem>>, vector<1x16x64xf32>
      %247 = vector.shape_cast %246 : vector<1x16x64xf32> to vector<16x64xf32>
      %c0_96 = arith.constant 0 : index
      %c0_97 = arith.constant 0 : index
      %c0_98 = arith.constant 0 : index
      %248 = vector.load %arg3[%c0_96, %c0_97, %c0_98] : memref<1x16x1xf32, #tpu.memory_space<vmem>>, vector<1x16x1xf32>
      %249 = vector.shape_cast %248 : vector<1x16x1xf32> to vector<16x1xf32>
      %250 = vector.broadcast %249 : vector<16x1xf32> to vector<16x64xf32>
      %251 = arith.mulf %247, %250 : vector<16x64xf32>
      %c0_99 = arith.constant 0 : index
      %c0_100 = arith.constant 0 : index
      %252 = vector.load %arg20[%c0_99, %c0_100] : memref<16x64xf32, #tpu.memory_space<vmem>>, vector<16x64xf32>
      tpu.vector_store %arg20[%c0_99, %c0_100], %251 {strides = array<i32>} : memref<16x64xf32, #tpu.memory_space<vmem>>, vector<16x64xf32>,
    } else {
    }
    %c0 = arith.constant 0 : index
    %c0_1 = arith.constant 0 : index
    %3 = vector.load %arg20[%c0, %c0_1] : memref<16x64xf32, #tpu.memory_space<vmem>>, vector<16x64xf32>
    %c0_2 = arith.constant 0 : index
    %c0_3 = arith.constant 0 : index
    %c0_4 = arith.constant 0 : index
    %4 = vector.load %arg3[%c0_2, %c0_3, %c0_4] : memref<1x16x1xf32, #tpu.memory_space<vmem>>, vector<1x16x1xf32>
    %5 = vector.shape_cast %4 : vector<1x16x1xf32> to vector<16x1xf32>
    %c0_5 = arith.constant 0 : index
    %c0_6 = arith.constant 0 : index
    %c0_7 = arith.constant 0 : index
    %6 = vector.load %arg4[%c0_5, %c0_6, %c0_7] : memref<1x1x16xf32, #tpu.memory_space<vmem>>, vector<1x1x16xf32>
    %7 = vector.shape_cast %6 : vector<1x1x16xf32> to vector<1x16xf32>
    %8 = vector.broadcast %5 : vector<16x1xf32> to vector<16x16xf32>
    %9 = vector.broadcast %7 : vector<1x16xf32> to vector<16x16xf32>
    %10 = arith.mulf %8, %9 : vector<16x16xf32>
    %cst = arith.constant 0.000000e+00 : f32
    %11 = vector.broadcast %cst : f32 to vector<16x16xf32>
    %12 = arith.cmpf one, %10, %11 : vector<16x16xf32>
    %13 = arith.truncf %3 : vector<16x64xf32> to vector<16x64xbf16>
    %c0_8 = arith.constant 0 : index
    %c0_9 = arith.constant 0 : index
    %c0_10 = arith.constant 0 : index
    %14 = vector.load %arg5[%c0_8, %c0_9, %c0_10] : memref<1x64x192xbf16, #tpu.memory_space<vmem>>, vector<1x64x192xbf16>
    %15 = vector.shape_cast %14 : vector<1x64x192xbf16> to vector<64x192xbf16>
    %cst_11 = arith.constant dense<0.000000e+00> : vector<16x192xf32>
    %16 = tpu.matmul %13, %15, %cst_11 {dimension_numbers = #tpu.dot_dimension_numbers<[1], [0], [0], [1], [0, 0, 1, 1], [], []>} : vector<16x64xbf16>, vector<64x192xbf16>, vector<16x192xf32> -> vector<16x192xf32>
    %c0_12 = arith.constant 0 : index
    %c0_13 = arith.constant 0 : index
    %c0_14 = arith.constant 0 : index
    %17 = vector.load %arg6[%c0_12, %c0_13, %c0_14] : memref<1x1x192xf32, #tpu.memory_space<vmem>>, vector<1x1x192xf32>
    %18 = vector.shape_cast %17 : vector<1x1x192xf32> to vector<1x192xf32>
    %19 = vector.broadcast %18 : vector<1x192xf32> to vector<16x192xf32>
    %20 = arith.addf %16, %19 : vector<16x192xf32>
    %21 = vector.extract_strided_slice %20 {offsets = [0, 0], sizes = [16, 16], strides = [1, 1]} : vector<16x192xf32> to vector<16x16xf32>
    %22 = vector.extract_strided_slice %20 {offsets = [0, 16], sizes = [16, 16], strides = [1, 1]} : vector<16x192xf32> to vector<16x16xf32>
    %23 = vector.extract_strided_slice %20 {offsets = [0, 32], sizes = [16, 16], strides = [1, 1]} : vector<16x192xf32> to vector<16x16xf32>
    %24 = vector.extract_strided_slice %20 {offsets = [0, 48], sizes = [16, 16], strides = [1, 1]} : vector<16x192xf32> to vector<16x16xf32>
    %25 = vector.shape_cast %21 : vector<16x16xf32> to vector<1x16x16xf32>
    %26 = vector.shape_cast %22 : vector<16x16xf32> to vector<1x16x16xf32>
    %27 = vector.shape_cast %23 : vector<16x16xf32> to vector<1x16x16xf32>
    %28 = vector.shape_cast %24 : vector<16x16xf32> to vector<1x16x16xf32>
    %29 = tpu.concatenate %25, %26, %27, %28 in 0 : vector<1x16x16xf32>, vector<1x16x16xf32>, vector<1x16x16xf32>, vector<1x16x16xf32> -> vector<4x16x16xf32>
    %cst_15 = arith.constant 2.500000e-01 : f32
    %30 = vector.broadcast %cst_15 : f32 to vector<4x16x16xf32>
    %31 = arith.mulf %29, %30 : vector<4x16x16xf32>
    %32 = arith.truncf %31 : vector<4x16x16xf32> to vector<4x16x16xbf16>
    %33 = vector.extract_strided_slice %20 {offsets = [0, 64], sizes = [16, 16], strides = [1, 1]} : vector<16x192xf32> to vector<16x16xf32>
    %34 = vector.extract_strided_slice %20 {offsets = [0, 80], sizes = [16, 16], strides = [1, 1]} : vector<16x192xf32> to vector<16x16xf32>
    %35 = vector.extract_strided_slice %20 {offsets = [0, 96], sizes = [16, 16], strides = [1, 1]} : vector<16x192xf32> to vector<16x16xf32>
    %36 = vector.extract_strided_slice %20 {offsets = [0, 112], sizes = [16, 16], strides = [1, 1]} : vector<16x192xf32> to vector<16x16xf32>
    %37 = vector.shape_cast %33 : vector<16x16xf32> to vector<1x16x16xf32>
    %38 = vector.shape_cast %34 : vector<16x16xf32> to vector<1x16x16xf32>
    %39 = vector.shape_cast %35 : vector<16x16xf32> to vector<1x16x16xf32>
    %40 = vector.shape_cast %36 : vector<16x16xf32> to vector<1x16x16xf32>
    %41 = tpu.concatenate %37, %38, %39, %40 in 0 : vector<1x16x16xf32>, vector<1x16x16xf32>, vector<1x16x16xf32>, vector<1x16x16xf32> -> vector<4x16x16xf32>
    %42 = arith.truncf %41 : vector<4x16x16xf32> to vector<4x16x16xbf16>
    %43 = vector.extract_strided_slice %20 {offsets = [0, 128], sizes = [16, 16], strides = [1, 1]} : vector<16x192xf32> to vector<16x16xf32>
    %44 = vector.extract_strided_slice %20 {offsets = [0, 144], sizes = [16, 16], strides = [1, 1]} : vector<16x192xf32> to vector<16x16xf32>
    %45 = vector.extract_strided_slice %20 {offsets = [0, 160], sizes = [16, 16], strides = [1, 1]} : vector<16x192xf32> to vector<16x16xf32>
    %46 = vector.extract_strided_slice %20 {offsets = [0, 176], sizes = [16, 16], strides = [1, 1]} : vector<16x192xf32> to vector<16x16xf32>
    %47 = vector.shape_cast %43 : vector<16x16xf32> to vector<1x16x16xf32>
    %48 = vector.shape_cast %44 : vector<16x16xf32> to vector<1x16x16xf32>
    %49 = vector.shape_cast %45 : vector<16x16xf32> to vector<1x16x16xf32>
    %50 = vector.shape_cast %46 : vector<16x16xf32> to vector<1x16x16xf32>
    %51 = tpu.concatenate %47, %48, %49, %50 in 0 : vector<1x16x16xf32>, vector<1x16x16xf32>, vector<1x16x16xf32>, vector<1x16x16xf32> -> vector<4x16x16xf32>
    %52 = arith.truncf %51 : vector<4x16x16xf32> to vector<4x16x16xbf16>
    "tpu.trace_start"() <{level = 10 : i32, message = "htd,hsd->hts"}> : () -> ()
    %cst_16 = arith.constant dense<0.000000e+00> : vector<4x16x16xf32>
    %53 = tpu.matmul %32, %42, %cst_16 {dimension_numbers = #tpu.dot_dimension_numbers<[2], [2], [1], [1], [0, 0, 0, 1, 1, 1], [0], [0]>} : vector<4x16x16xbf16>, vector<4x16x16xbf16>, vector<4x16x16xf32> -> vector<4x16x16xf32>
    "tpu.trace_stop"() : () -> ()
    %c0_17 = arith.constant 0 : index
    %c0_18 = arith.constant 0 : index
    %c0_19 = arith.constant 0 : index
    %54 = vector.load %arg9[%c0_17, %c0_18, %c0_19] : memref<1x31x16xbf16, #tpu.memory_space<vmem>>, vector<1x31x16xbf16>
    %55 = vector.shape_cast %54 : vector<1x31x16xbf16> to vector<31x16xbf16>
    %56 = vector.shape_cast %55 : vector<31x16xbf16> to vector<1x31x16xbf16>
    %57 = vector.broadcast %56 : vector<1x31x16xbf16> to vector<4x31x16xbf16>
    "tpu.trace_start"() <{level = 10 : i32, message = "htd,hrd->htr"}> : () -> ()
    %cst_20 = arith.constant dense<0.000000e+00> : vector<4x16x31xf32>
    %58 = tpu.matmul %32, %57, %cst_20 {dimension_numbers = #tpu.dot_dimension_numbers<[2], [2], [1], [1], [0, 0, 0, 1, 1, 1], [0], [0]>} : vector<4x16x16xbf16>, vector<4x31x16xbf16>, vector<4x16x31xf32> -> vector<4x16x31xf32>
    "tpu.trace_stop"() : () -> ()
    %59 = tpu.iota {dimensions = array<i32: 1>} : vector<4x16x31xi32>
    %c15_i32 = arith.constant 15 : i32
    %60 = vector.broadcast %c15_i32 : i32 to vector<4x16x31xi32>
    %61 = arith.subi %60, %59 : vector<4x16x31xi32>
    %62 = vector.extract_strided_slice %58 {offsets = [0, 0, 1], sizes = [4, 16, 30], strides = [1, 1, 1]} : vector<4x16x31xf32> to vector<4x16x30xf32>
    %63 = vector.extract_strided_slice %58 {offsets = [0, 0, 0], sizes = [4, 16, 1], strides = [1, 1, 1]} : vector<4x16x31xf32> to vector<4x16x1xf32>
    %64 = tpu.concatenate %62, %63 in 2 : vector<4x16x30xf32>, vector<4x16x1xf32> -> vector<4x16x31xf32>
    %c1_i32 = arith.constant 1 : i32
    %65 = vector.broadcast %c1_i32 : i32 to vector<4x16x31xi32>
    %66 = arith.andi %61, %65 : vector<4x16x31xi32>
    %c0_i32_21 = arith.constant 0 : i32
    %67 = vector.broadcast %c0_i32_21 : i32 to vector<4x16x31xi32>
    %68 = arith.cmpi ne, %66, %67 : vector<4x16x31xi32>
    %69 = arith.select %68, %64, %58 : vector<4x16x31xi1>, vector<4x16x31xf32>
    %70 = vector.extract_strided_slice %69 {offsets = [0, 0, 2], sizes = [4, 16, 29], strides = [1, 1, 1]} : vector<4x16x31xf32> to vector<4x16x29xf32>
    %71 = vector.extract_strided_slice %69 {offsets = [0, 0, 0], sizes = [4, 16, 2], strides = [1, 1, 1]} : vector<4x16x31xf32> to vector<4x16x2xf32>
    %72 = tpu.concatenate %70, %71 in 2 : vector<4x16x29xf32>, vector<4x16x2xf32> -> vector<4x16x31xf32>
    %c2_i32 = arith.constant 2 : i32
    %73 = vector.broadcast %c2_i32 : i32 to vector<4x16x31xi32>
    %74 = arith.andi %61, %73 : vector<4x16x31xi32>
    %c0_i32_22 = arith.constant 0 : i32
    %75 = vector.broadcast %c0_i32_22 : i32 to vector<4x16x31xi32>
    %76 = arith.cmpi ne, %74, %75 : vector<4x16x31xi32>
    %77 = arith.select %76, %72, %69 : vector<4x16x31xi1>, vector<4x16x31xf32>
    %78 = vector.extract_strided_slice %77 {offsets = [0, 0, 4], sizes = [4, 16, 27], strides = [1, 1, 1]} : vector<4x16x31xf32> to vector<4x16x27xf32>
    %79 = vector.extract_strided_slice %77 {offsets = [0, 0, 0], sizes = [4, 16, 4], strides = [1, 1, 1]} : vector<4x16x31xf32> to vector<4x16x4xf32>
    %80 = tpu.concatenate %78, %79 in 2 : vector<4x16x27xf32>, vector<4x16x4xf32> -> vector<4x16x31xf32>
    %c4_i32 = arith.constant 4 : i32
    %81 = vector.broadcast %c4_i32 : i32 to vector<4x16x31xi32>
    %82 = arith.andi %61, %81 : vector<4x16x31xi32>
    %c0_i32_23 = arith.constant 0 : i32
    %83 = vector.broadcast %c0_i32_23 : i32 to vector<4x16x31xi32>
    %84 = arith.cmpi ne, %82, %83 : vector<4x16x31xi32>
    %85 = arith.select %84, %80, %77 : vector<4x16x31xi1>, vector<4x16x31xf32>
    %86 = vector.extract_strided_slice %85 {offsets = [0, 0, 8], sizes = [4, 16, 23], strides = [1, 1, 1]} : vector<4x16x31xf32> to vector<4x16x23xf32>
    %87 = vector.extract_strided_slice %85 {offsets = [0, 0, 0], sizes = [4, 16, 8], strides = [1, 1, 1]} : vector<4x16x31xf32> to vector<4x16x8xf32>
    %88 = tpu.concatenate %86, %87 in 2 : vector<4x16x23xf32>, vector<4x16x8xf32> -> vector<4x16x31xf32>
    %c8_i32 = arith.constant 8 : i32
    %89 = vector.broadcast %c8_i32 : i32 to vector<4x16x31xi32>
    %90 = arith.andi %61, %89 : vector<4x16x31xi32>
    %c0_i32_24 = arith.constant 0 : i32
    %91 = vector.broadcast %c0_i32_24 : i32 to vector<4x16x31xi32>
    %92 = arith.cmpi ne, %90, %91 : vector<4x16x31xi32>
    %93 = arith.select %92, %88, %85 : vector<4x16x31xi1>, vector<4x16x31xf32>
    %94 = vector.extract_strided_slice %93 {offsets = [0, 0, 0], sizes = [4, 16, 16], strides = [1, 1, 1]} : vector<4x16x31xf32> to vector<4x16x16xf32>
    %95 = arith.addf %53, %94 : vector<4x16x16xf32>
    %96 = vector.shape_cast %12 : vector<16x16xi1> to vector<1x16x16xi1>
    %cst_25 = arith.constant -1.000000e+04 : f32
    %97 = vector.shape_cast %96 : vector<1x16x16xi1> to vector<1x16x16xi1>
    %98 = vector.broadcast %97 : vector<1x16x16xi1> to vector<4x16x16xi1>
    %99 = vector.broadcast %cst_25 : f32 to vector<4x16x16xf32>
    %100 = arith.select %98, %95, %99 : vector<4x16x16xi1>, vector<4x16x16xf32>
    %cst_26 = arith.constant dense<0xFF800000> : vector<4x16xf32>
    %101 = vector.multi_reduction <maximumf>, %100, %cst_26 [2] : vector<4x16x16xf32> to vector<4x16xf32>
    %102 = vector.shape_cast %101 : vector<4x16xf32> to vector<4x16x1xf32>
    %103 = vector.broadcast %102 : vector<4x16x1xf32> to vector<4x16x16xf32>
    %104 = arith.subf %100, %103 : vector<4x16x16xf32>
    %105 = math.exp %104 : vector<4x16x16xf32>
    %cst_27 = arith.constant dense<0.000000e+00> : vector<4x16xf32>
    %106 = vector.multi_reduction <add>, %105, %cst_27 [2] : vector<4x16x16xf32> to vector<4x16xf32>
    %107 = vector.shape_cast %106 : vector<4x16xf32> to vector<4x16x1xf32>
    %108 = tpu.reciprocal %107 {approx = true} : vector<4x16x1xf32> -> vector<4x16x1xf32>
    %109 = vector.broadcast %108 : vector<4x16x1xf32> to vector<4x16x16xf32>
    %110 = arith.mulf %105, %109 : vector<4x16x16xf32>
    %111 = arith.truncf %110 : vector<4x16x16xf32> to vector<4x16x16xbf16>
    "tpu.trace_start"() <{level = 10 : i32, message = "hts,hsd->htd"}> : () -> ()
    %cst_28 = arith.constant dense<0.000000e+00> : vector<4x16x16xf32>
    %112 = tpu.matmul %111, %52, %cst_28 {dimension_numbers = #tpu.dot_dimension_numbers<[2], [1], [1], [2], [0, 0, 0, 1, 1, 2], [0], [0]>} : vector<4x16x16xbf16>, vector<4x16x16xbf16>, vector<4x16x16xf32> -> vector<4x16x16xf32>
    %cst_29 = arith.constant 0.000000e+00 : f32
    "tpu.trace_stop"() : () -> ()
    %113 = vector.broadcast %cst_29 : f32 to vector<4x16x15xf32>
    %114 = tpu.concatenate %110, %113 in 2 : vector<4x16x16xf32>, vector<4x16x15xf32> -> vector<4x16x31xf32>
    %115 = tpu.iota {dimensions = array<i32: 1>} : vector<4x16x31xi32>
    %c15_i32_30 = arith.constant 15 : i32
    %116 = vector.broadcast %c15_i32_30 : i32 to vector<4x16x31xi32>
    %117 = arith.subi %116, %115 : vector<4x16x31xi32>
    %118 = vector.extract_strided_slice %114 {offsets = [0, 0, 30], sizes = [4, 16, 1], strides = [1, 1, 1]} : vector<4x16x31xf32> to vector<4x16x1xf32>
    %119 = vector.extract_strided_slice %114 {offsets = [0, 0, 0], sizes = [4, 16, 30], strides = [1, 1, 1]} : vector<4x16x31xf32> to vector<4x16x30xf32>
    %120 = tpu.concatenate %118, %119 in 2 : vector<4x16x1xf32>, vector<4x16x30xf32> -> vector<4x16x31xf32>
    %c1_i32_31 = arith.constant 1 : i32
    %121 = vector.broadcast %c1_i32_31 : i32 to vector<4x16x31xi32>
    %122 = arith.andi %117, %121 : vector<4x16x31xi32>
    %c0_i32_32 = arith.constant 0 : i32
    %123 = vector.broadcast %c0_i32_32 : i32 to vector<4x16x31xi32>
    %124 = arith.cmpi ne, %122, %123 : vector<4x16x31xi32>
    %125 = arith.select %124, %120, %114 : vector<4x16x31xi1>, vector<4x16x31xf32>
    %126 = vector.extract_strided_slice %125 {offsets = [0, 0, 29], sizes = [4, 16, 2], strides = [1, 1, 1]} : vector<4x16x31xf32> to vector<4x16x2xf32>
    %127 = vector.extract_strided_slice %125 {offsets = [0, 0, 0], sizes = [4, 16, 29], strides = [1, 1, 1]} : vector<4x16x31xf32> to vector<4x16x29xf32>
    %128 = tpu.concatenate %126, %127 in 2 : vector<4x16x2xf32>, vector<4x16x29xf32> -> vector<4x16x31xf32>
    %c2_i32_33 = arith.constant 2 : i32
    %129 = vector.broadcast %c2_i32_33 : i32 to vector<4x16x31xi32>
    %130 = arith.andi %117, %129 : vector<4x16x31xi32>
    %c0_i32_34 = arith.constant 0 : i32
    %131 = vector.broadcast %c0_i32_34 : i32 to vector<4x16x31xi32>
    %132 = arith.cmpi ne, %130, %131 : vector<4x16x31xi32>
    %133 = arith.select %132, %128, %125 : vector<4x16x31xi1>, vector<4x16x31xf32>
    %134 = vector.extract_strided_slice %133 {offsets = [0, 0, 27], sizes = [4, 16, 4], strides = [1, 1, 1]} : vector<4x16x31xf32> to vector<4x16x4xf32>
    %135 = vector.extract_strided_slice %133 {offsets = [0, 0, 0], sizes = [4, 16, 27], strides = [1, 1, 1]} : vector<4x16x31xf32> to vector<4x16x27xf32>
    %136 = tpu.concatenate %134, %135 in 2 : vector<4x16x4xf32>, vector<4x16x27xf32> -> vector<4x16x31xf32>
    %c4_i32_35 = arith.constant 4 : i32
    %137 = vector.broadcast %c4_i32_35 : i32 to vector<4x16x31xi32>
    %138 = arith.andi %117, %137 : vector<4x16x31xi32>
    %c0_i32_36 = arith.constant 0 : i32
    %139 = vector.broadcast %c0_i32_36 : i32 to vector<4x16x31xi32>
    %140 = arith.cmpi ne, %138, %139 : vector<4x16x31xi32>
    %141 = arith.select %140, %136, %133 : vector<4x16x31xi1>, vector<4x16x31xf32>
    %142 = vector.extract_strided_slice %141 {offsets = [0, 0, 23], sizes = [4, 16, 8], strides = [1, 1, 1]} : vector<4x16x31xf32> to vector<4x16x8xf32>
    %143 = vector.extract_strided_slice %141 {offsets = [0, 0, 0], sizes = [4, 16, 23], strides = [1, 1, 1]} : vector<4x16x31xf32> to vector<4x16x23xf32>
    %144 = tpu.concatenate %142, %143 in 2 : vector<4x16x8xf32>, vector<4x16x23xf32> -> vector<4x16x31xf32>
    %c8_i32_37 = arith.constant 8 : i32
    %145 = vector.broadcast %c8_i32_37 : i32 to vector<4x16x31xi32>
    %146 = arith.andi %117, %145 : vector<4x16x31xi32>
    %c0_i32_38 = arith.constant 0 : i32
    %147 = vector.broadcast %c0_i32_38 : i32 to vector<4x16x31xi32>
    %148 = arith.cmpi ne, %146, %147 : vector<4x16x31xi32>
    %149 = arith.select %148, %144, %141 : vector<4x16x31xi1>, vector<4x16x31xf32>
    %150 = arith.truncf %149 : vector<4x16x31xf32> to vector<4x16x31xbf16>
    %c0_39 = arith.constant 0 : index
    %c0_40 = arith.constant 0 : index
    %c0_41 = arith.constant 0 : index
    %151 = vector.load %arg10[%c0_39, %c0_40, %c0_41] : memref<1x31x16xbf16, #tpu.memory_space<vmem>>, vector<1x31x16xbf16>
    %152 = vector.shape_cast %151 : vector<1x31x16xbf16> to vector<31x16xbf16>
    %153 = vector.shape_cast %152 : vector<31x16xbf16> to vector<1x31x16xbf16>
    %154 = vector.broadcast %153 : vector<1x31x16xbf16> to vector<4x31x16xbf16>
    "tpu.trace_start"() <{level = 10 : i32, message = "htr,hrd->htd"}> : () -> ()
    %cst_42 = arith.constant dense<0.000000e+00> : vector<4x16x16xf32>
    %155 = tpu.matmul %150, %154, %cst_42 {dimension_numbers = #tpu.dot_dimension_numbers<[2], [1], [1], [2], [0, 0, 0, 1, 1, 2], [0], [0]>} : vector<4x16x31xbf16>, vector<4x31x16xbf16>, vector<4x16x16xf32> -> vector<4x16x16xf32>
    "tpu.trace_stop"() : () -> ()
    %156 = arith.addf %112, %155 : vector<4x16x16xf32>
    %157 = arith.truncf %156 : vector<4x16x16xf32> to vector<4x16x16xbf16>
    %c0_43 = arith.constant 0 : index
    %c0_44 = arith.constant 0 : index
    %c0_45 = arith.constant 0 : index
    %c0_46 = arith.constant 0 : index
    %158 = vector.load %arg7[%c0_43, %c0_44, %c0_45, %c0_46] : memref<1x4x16x64xbf16, #tpu.memory_space<vmem>>, vector<1x4x16x64xbf16>
    %159 = vector.shape_cast %158 : vector<1x4x16x64xbf16> to vector<4x16x64xbf16>
    "tpu.trace_start"() <{level = 10 : i32, message = "htd,hdc->htc"}> : () -> ()
    %cst_47 = arith.constant dense<0.000000e+00> : vector<4x16x64xf32>
    %160 = tpu.matmul %157, %159, %cst_47 {dimension_numbers = #tpu.dot_dimension_numbers<[2], [1], [1], [2], [0, 0, 0, 1, 1, 2], [0], [0]>} : vector<4x16x16xbf16>, vector<4x16x64xbf16>, vector<4x16x64xf32> -> vector<4x16x64xf32>
    "tpu.trace_stop"() : () -> ()
    %cst_48 = arith.constant dense<0.000000e+00> : vector<16x64xf32>
    %161 = vector.multi_reduction <add>, %160, %cst_48 [0] : vector<4x16x64xf32> to vector<16x64xf32>
    %c0_49 = arith.constant 0 : index
    %c0_50 = arith.constant 0 : index
    %c0_51 = arith.constant 0 : index
    %162 = vector.load %arg8[%c0_49, %c0_50, %c0_51] : memref<1x1x64xf32, #tpu.memory_space<vmem>>, vector<1x1x64xf32>
    %163 = vector.shape_cast %162 : vector<1x1x64xf32> to vector<1x64xf32>
    %164 = vector.broadcast %163 : vector<1x64xf32> to vector<16x64xf32>
    %165 = arith.addf %161, %164 : vector<16x64xf32>
    %166 = arith.addf %3, %165 : vector<16x64xf32>
    %c0_52 = arith.constant 0 : index
    %c0_53 = arith.constant 0 : index
    %c0_54 = arith.constant 0 : index
    %167 = vector.load %arg11[%c0_52, %c0_53, %c0_54] : memref<1x1x64xf32, #tpu.memory_space<vmem>>, vector<1x1x64xf32>
    %168 = vector.shape_cast %167 : vector<1x1x64xf32> to vector<1x64xf32>
    %c0_55 = arith.constant 0 : index
    %c0_56 = arith.constant 0 : index
    %c0_57 = arith.constant 0 : index
    %169 = vector.load %arg12[%c0_55, %c0_56, %c0_57] : memref<1x1x64xf32, #tpu.memory_space<vmem>>, vector<1x1x64xf32>
    %170 = vector.shape_cast %169 : vector<1x1x64xf32> to vector<1x64xf32>
    %cst_58 = arith.constant dense<0.000000e+00> : vector<16xf32>
    %171 = vector.multi_reduction <add>, %166, %cst_58 [1] : vector<16x64xf32> to vector<16xf32>
    %172 = vector.shape_cast %171 : vector<16xf32> to vector<16x1xf32>
    %cst_59 = arith.constant 6.400000e+01 : f32
    %173 = vector.broadcast %cst_59 : f32 to vector<16x1xf32>
    %174 = arith.divf %172, %173 : vector<16x1xf32>
    %175 = vector.broadcast %174 : vector<16x1xf32> to vector<16x64xf32>
    %176 = arith.subf %166, %175 : vector<16x64xf32>
    %177 = arith.mulf %176, %176 : vector<16x64xf32>
    %cst_60 = arith.constant dense<0.000000e+00> : vector<16xf32>
    %178 = vector.multi_reduction <add>, %177, %cst_60 [1] : vector<16x64xf32> to vector<16xf32>
    %179 = vector.shape_cast %178 : vector<16xf32> to vector<16x1xf32>
    %cst_61 = arith.constant 6.400000e+01 : f32
    %180 = vector.broadcast %cst_61 : f32 to vector<16x1xf32>
    %181 = arith.divf %179, %180 : vector<16x1xf32>
    %182 = vector.broadcast %174 : vector<16x1xf32> to vector<16x64xf32>
    %183 = arith.subf %166, %182 : vector<16x64xf32>
    %cst_62 = arith.constant 9.99999974E-6 : f32
    %184 = vector.broadcast %cst_62 : f32 to vector<16x1xf32>
    %185 = arith.addf %181, %184 : vector<16x1xf32>
    %186 = math.rsqrt %185 : vector<16x1xf32>
    %187 = vector.broadcast %186 : vector<16x1xf32> to vector<16x64xf32>
    %188 = arith.mulf %183, %187 : vector<16x64xf32>
    %189 = vector.broadcast %168 : vector<1x64xf32> to vector<16x64xf32>
    %190 = arith.mulf %188, %189 : vector<16x64xf32>
    %191 = vector.broadcast %170 : vector<1x64xf32> to vector<16x64xf32>
    %192 = arith.addf %190, %191 : vector<16x64xf32>
    %193 = vector.broadcast %5 : vector<16x1xf32> to vector<16x64xf32>
    %194 = arith.mulf %192, %193 : vector<16x64xf32>
    %195 = arith.truncf %194 : vector<16x64xf32> to vector<16x64xbf16>
    %c0_63 = arith.constant 0 : index
    %c0_64 = arith.constant 0 : index
    %c0_65 = arith.constant 0 : index
    %196 = vector.load %arg15[%c0_63, %c0_64, %c0_65] : memref<1x64x128xbf16, #tpu.memory_space<vmem>>, vector<1x64x128xbf16>
    %197 = vector.shape_cast %196 : vector<1x64x128xbf16> to vector<64x128xbf16>
    %cst_66 = arith.constant dense<0.000000e+00> : vector<16x128xf32>
    %198 = tpu.matmul %195, %197, %cst_66 {dimension_numbers = #tpu.dot_dimension_numbers<[1], [0], [0], [1], [0, 0, 1, 1], [], []>} : vector<16x64xbf16>, vector<64x128xbf16>, vector<16x128xf32> -> vector<16x128xf32>
    %c0_67 = arith.constant 0 : index
    %c0_68 = arith.constant 0 : index
    %c0_69 = arith.constant 0 : index
    %199 = vector.load %arg16[%c0_67, %c0_68, %c0_69] : memref<1x1x128xf32, #tpu.memory_space<vmem>>, vector<1x1x128xf32>
    %200 = vector.shape_cast %199 : vector<1x1x128xf32> to vector<1x128xf32>
    %201 = vector.broadcast %200 : vector<1x128xf32> to vector<16x128xf32>
    %202 = arith.addf %198, %201 : vector<16x128xf32>
    %cst_70 = arith.constant 0.000000e+00 : f32
    %203 = vector.broadcast %cst_70 : f32 to vector<16x128xf32>
    %204 = arith.maximumf %202, %203 : vector<16x128xf32>
    %205 = arith.truncf %204 : vector<16x128xf32> to vector<16x128xbf16>
    %c0_71 = arith.constant 0 : index
    %c0_72 = arith.constant 0 : index
    %c0_73 = arith.constant 0 : index
    %206 = vector.load %arg17[%c0_71, %c0_72, %c0_73] : memref<1x128x64xbf16, #tpu.memory_space<vmem>>, vector<1x128x64xbf16>
    %207 = vector.shape_cast %206 : vector<1x128x64xbf16> to vector<128x64xbf16>
    %cst_74 = arith.constant dense<0.000000e+00> : vector<16x64xf32>
    %208 = tpu.matmul %205, %207, %cst_74 {dimension_numbers = #tpu.dot_dimension_numbers<[1], [0], [0], [1], [0, 0, 1, 1], [], []>} : vector<16x128xbf16>, vector<128x64xbf16>, vector<16x64xf32> -> vector<16x64xf32>
    %c0_75 = arith.constant 0 : index
    %c0_76 = arith.constant 0 : index
    %c0_77 = arith.constant 0 : index
    %209 = vector.load %arg18[%c0_75, %c0_76, %c0_77] : memref<1x1x64xf32, #tpu.memory_space<vmem>>, vector<1x1x64xf32>
    %210 = vector.shape_cast %209 : vector<1x1x64xf32> to vector<1x64xf32>
    %211 = vector.broadcast %210 : vector<1x64xf32> to vector<16x64xf32>
    %212 = arith.addf %208, %211 : vector<16x64xf32>
    %213 = vector.broadcast %5 : vector<16x1xf32> to vector<16x64xf32>
    %214 = arith.mulf %212, %213 : vector<16x64xf32>
    %215 = arith.addf %192, %214 : vector<16x64xf32>
    %c0_78 = arith.constant 0 : index
    %c0_79 = arith.constant 0 : index
    %c0_80 = arith.constant 0 : index
    %216 = vector.load %arg13[%c0_78, %c0_79, %c0_80] : memref<1x1x64xf32, #tpu.memory_space<vmem>>, vector<1x1x64xf32>
    %217 = vector.shape_cast %216 : vector<1x1x64xf32> to vector<1x64xf32>
    %c0_81 = arith.constant 0 : index
    %c0_82 = arith.constant 0 : index
    %c0_83 = arith.constant 0 : index
    %218 = vector.load %arg14[%c0_81, %c0_82, %c0_83] : memref<1x1x64xf32, #tpu.memory_space<vmem>>, vector<1x1x64xf32>
    %219 = vector.shape_cast %218 : vector<1x1x64xf32> to vector<1x64xf32>
    %cst_84 = arith.constant dense<0.000000e+00> : vector<16xf32>
    %220 = vector.multi_reduction <add>, %215, %cst_84 [1] : vector<16x64xf32> to vector<16xf32>
    %221 = vector.shape_cast %220 : vector<16xf32> to vector<16x1xf32>
    %cst_85 = arith.constant 6.400000e+01 : f32
    %222 = vector.broadcast %cst_85 : f32 to vector<16x1xf32>
    %223 = arith.divf %221, %222 : vector<16x1xf32>
    %224 = vector.broadcast %223 : vector<16x1xf32> to vector<16x64xf32>
    %225 = arith.subf %215, %224 : vector<16x64xf32>
    %226 = arith.mulf %225, %225 : vector<16x64xf32>
    %cst_86 = arith.constant dense<0.000000e+00> : vector<16xf32>
    %227 = vector.multi_reduction <add>, %226, %cst_86 [1] : vector<16x64xf32> to vector<16xf32>
    %228 = vector.shape_cast %227 : vector<16xf32> to vector<16x1xf32>
    %cst_87 = arith.constant 6.400000e+01 : f32
    %229 = vector.broadcast %cst_87 : f32 to vector<16x1xf32>
    %230 = arith.divf %228, %229 : vector<16x1xf32>
    %231 = vector.broadcast %223 : vector<16x1xf32> to vector<16x64xf32>
    %232 = arith.subf %215, %231 : vector<16x64xf32>
    %cst_88 = arith.constant 9.99999974E-6 : f32
    %233 = vector.broadcast %cst_88 : f32 to vector<16x1xf32>
    %234 = arith.addf %230, %233 : vector<16x1xf32>
    %235 = math.rsqrt %234 : vector<16x1xf32>
    %236 = vector.broadcast %235 : vector<16x1xf32> to vector<16x64xf32>
    %237 = arith.mulf %232, %236 : vector<16x64xf32>
    %238 = vector.broadcast %217 : vector<1x64xf32> to vector<16x64xf32>
    %239 = arith.mulf %237, %238 : vector<16x64xf32>
    %240 = vector.broadcast %219 : vector<1x64xf32> to vector<16x64xf32>
    %241 = arith.addf %239, %240 : vector<16x64xf32>
    %c0_89 = arith.constant 0 : index
    %c0_90 = arith.constant 0 : index
    %242 = vector.load %arg20[%c0_89, %c0_90] : memref<16x64xf32, #tpu.memory_space<vmem>>, vector<16x64xf32>
    tpu.vector_store %arg20[%c0_89, %c0_90], %241 {strides = array<i32>} : memref<16x64xf32, #tpu.memory_space<vmem>>, vector<16x64xf32>,
    %c1_i32_91 = arith.constant 1 : i32
    %243 = arith.cmpi eq, %arg1, %c1_i32_91 : i32
    %244 = arith.extui %243 : i1 to i32
    %c0_i32_92 = arith.constant 0 : i32
    %245 = arith.cmpi ne, %244, %c0_i32_92 : i32
    scf.if %245 {
      %246 = vector.broadcast %5 : vector<16x1xf32> to vector<16x64xf32>
      %247 = arith.mulf %241, %246 : vector<16x64xf32>
      %c0_93 = arith.constant 0 : index
      %c0_94 = arith.constant 0 : index
      %c0_95 = arith.constant 0 : index
      %248 = vector.load %arg19[%c0_93, %c0_94, %c0_95] : memref<1x16x64xf32, #tpu.memory_space<vmem>>, vector<1x16x64xf32>
      %249 = vector.shape_cast %248 : vector<1x16x64xf32> to vector<16x64xf32>
      %250 = vector.shape_cast %247 : vector<16x64xf32> to vector<1x16x64xf32>
      tpu.vector_store %arg19[%c0_93, %c0_94, %c0_95], %250 {strides = array<i32>} : memref<1x16x64xf32, #tpu.memory_space<vmem>>, vector<1x16x64xf32>,
    } else {
    }
    return
  }
  func.func @transform_0(%arg0: i32, %arg1: i32) -> (i32, i32, i32) {
    %c0_i32 = arith.constant 0 : i32
    %c0_i32_0 = arith.constant 0 : i32
    %c0_i32_1 = arith.constant 0 : i32
    return %arg0, %c0_i32, %c0_i32_0 : i32, i32, i32
  }
  func.func @transform_1(%arg0: i32, %arg1: i32) -> (i32, i32, i32) {
    %c0_i32 = arith.constant 0 : i32
    %c0_i32_0 = arith.constant 0 : i32
    %c0_i32_1 = arith.constant 0 : i32
    return %arg0, %c0_i32, %c0_i32_0 : i32, i32, i32
  }
  func.func @transform_2(%arg0: i32, %arg1: i32) -> (i32, i32, i32) {
    %c0_i32 = arith.constant 0 : i32
    %c0_i32_0 = arith.constant 0 : i32
    %c0_i32_1 = arith.constant 0 : i32
    return %arg0, %c0_i32, %c0_i32_0 : i32, i32, i32
  }
  func.func @transform_3(%arg0: i32, %arg1: i32) -> (i32, i32, i32) {
    %c0_i32 = arith.constant 0 : i32
    %c0_i32_0 = arith.constant 0 : i32
    %c0_i32_1 = arith.constant 0 : i32
    return %arg1, %c0_i32, %c0_i32_0 : i32, i32, i32
  }
  func.func @transform_4(%arg0: i32, %arg1: i32) -> (i32, i32, i32) {
    %c0_i32 = arith.constant 0 : i32
    %c0_i32_0 = arith.constant 0 : i32
    %c0_i32_1 = arith.constant 0 : i32
    return %arg1, %c0_i32, %c0_i32_0 : i32, i32, i32
  }
  func.func @transform_5(%arg0: i32, %arg1: i32) -> (i32, i32, i32, i32) {
    %c0_i32 = arith.constant 0 : i32
    %c0_i32_0 = arith.constant 0 : i32
    %c0_i32_1 = arith.constant 0 : i32
    %c0_i32_2 = arith.constant 0 : i32
    return %arg1, %c0_i32, %c0_i32_0, %c0_i32_1 : i32, i32, i32, i32
  }
  func.func @transform_6(%arg0: i32, %arg1: i32) -> (i32, i32, i32) {
    %c0_i32 = arith.constant 0 : i32
    %c0_i32_0 = arith.constant 0 : i32
    %c0_i32_1 = arith.constant 0 : i32
    return %arg1, %c0_i32, %c0_i32_0 : i32, i32, i32
  }
  func.func @transform_7(%arg0: i32, %arg1: i32) -> (i32, i32, i32) {
    %c0_i32 = arith.constant 0 : i32
    %c0_i32_0 = arith.constant 0 : i32
    %c0_i32_1 = arith.constant 0 : i32
    return %arg1, %c0_i32, %c0_i32_0 : i32, i32, i32
  }
  func.func @transform_8(%arg0: i32, %arg1: i32) -> (i32, i32, i32) {
    %c0_i32 = arith.constant 0 : i32
    %c0_i32_0 = arith.constant 0 : i32
    %c0_i32_1 = arith.constant 0 : i32
    return %arg1, %c0_i32, %c0_i32_0 : i32, i32, i32
  }
  func.func @transform_9(%arg0: i32, %arg1: i32) -> (i32, i32, i32) {
    %c0_i32 = arith.constant 0 : i32
    %c0_i32_0 = arith.constant 0 : i32
    %c0_i32_1 = arith.constant 0 : i32
    return %arg1, %c0_i32, %c0_i32_0 : i32, i32, i32
  }
  func.func @transform_10(%arg0: i32, %arg1: i32) -> (i32, i32, i32) {
    %c0_i32 = arith.constant 0 : i32
    %c0_i32_0 = arith.constant 0 : i32
    %c0_i32_1 = arith.constant 0 : i32
    return %arg1, %c0_i32, %c0_i32_0 : i32, i32, i32
  }
  func.func @transform_11(%arg0: i32, %arg1: i32) -> (i32, i32, i32) {
    %c0_i32 = arith.constant 0 : i32
    %c0_i32_0 = arith.constant 0 : i32
    %c0_i32_1 = arith.constant 0 : i32
    return %arg1, %c0_i32, %c0_i32_0 : i32, i32, i32
  }
  func.func @transform_12(%arg0: i32, %arg1: i32) -> (i32, i32, i32) {
    %c0_i32 = arith.constant 0 : i32
    %c0_i32_0 = arith.constant 0 : i32
    %c0_i32_1 = arith.constant 0 : i32
    return %arg1, %c0_i32, %c0_i32_0 : i32, i32, i32
  }
  func.func @transform_13(%arg0: i32, %arg1: i32) -> (i32, i32, i32) {
    %c0_i32 = arith.constant 0 : i32
    %c0_i32_0 = arith.constant 0 : i32
    %c0_i32_1 = arith.constant 0 : i32
    return %arg1, %c0_i32, %c0_i32_0 : i32, i32, i32
  }
  func.func @transform_14(%arg0: i32, %arg1: i32) -> (i32, i32, i32) {
    %c0_i32 = arith.constant 0 : i32
    %c0_i32_0 = arith.constant 0 : i32
    %c0_i32_1 = arith.constant 0 : i32
    return %arg1, %c0_i32, %c0_i32_0 : i32, i32, i32
  }
  func.func @transform_15(%arg0: i32, %arg1: i32) -> (i32, i32, i32) {
    %c0_i32 = arith.constant 0 : i32
    %c0_i32_0 = arith.constant 0 : i32
    %c0_i32_1 = arith.constant 0 : i32
    return %arg1, %c0_i32, %c0_i32_0 : i32, i32, i32
  }
  func.func @transform_16(%arg0: i32, %arg1: i32) -> (i32, i32, i32) {
    %c0_i32 = arith.constant 0 : i32
    %c0_i32_0 = arith.constant 0 : i32
    %c0_i32_1 = arith.constant 0 : i32
    return %arg1, %c0_i32, %c0_i32_0 : i32, i32, i32
  }
  func.func @transform_17(%arg0: i32, %arg1: i32) -> (i32, i32, i32) {
    %c0_i32 = arith.constant 0 : i32
    %c0_i32_0 = arith.constant 0 : i32
    %c0_i32_1 = arith.constant 0 : i32
    return %arg0, %c0_i32, %c0_i32_0 : i32, i32, i32
  }
}

</mosaic_0001>

<bundles_post_ra>
// kernel: encoder_forward.1
= control target key start
LH: loop header
LB: loop body
LE: loop exit
PB: predicated region body
PF: predicated region fallthrough
CT: control target
= control target key end

     0   :  { %s5146_s0 = inlined_call_operand.vmem [shape: f32[2,16,64], index: 0, kind: input, shape index: {}]   ;;  %s5147_s1 = inlined_call_operand.vmem [shape: f32[2,16,1], index: 1, kind: input, shape index: {}]   ;;  %s5148_s2 = inlined_call_operand.vmem [shape: f32[2,1,16], index: 2, kind: input, shape index: {}]   ;;  %s5149_s3 = inlined_call_operand.vmem [shape: bf16[2,64,192], index: 3, kind: input, shape index: {}]   ;;  %s5150_s4 = inlined_call_operand.vmem [shape: f32[2,1,192], index: 4, kind: input, shape index: {}]   ;;  %s5151_s5 = inlined_call_operand.vmem [shape: bf16[2,4,16,64], index: 5, kind: input, shape index: {}]   ;;  %s5152_s6 = inlined_call_operand.vmem [shape: f32[2,1,64], index: 6, kind: input, shape index: {}]   ;;  %s5153_s7 = inlined_call_operand.vmem [shape: bf16[2,31,16], index: 7, kind: input, shape index: {}]   ;;  %s5154_s8 = inlined_call_operand.vmem [shape: bf16[2,31,16], index: 8, kind: input, shape index: {}]   ;;  %s5155_s9 = inlined_call_operand.vmem [shape: f32[2,1,64], index: 9, kind: input, shape index: {}]   ;;  %s5156_s10 = inlined_call_operand.vmem [shape: f32[2,1,64], index: 10, kind: input, shape index: {}]   ;;  %s5157_s11 = inlined_call_operand.vmem [shape: f32[2,1,64], index: 11, kind: input, shape index: {}]   ;;  %s5158_s12 = inlined_call_operand.vmem [shape: f32[2,1,64], index: 12, kind: input, shape index: {}]   ;;  %s5159_s13 = inlined_call_operand.vmem [shape: bf16[2,64,128], index: 13, kind: input, shape index: {}]   ;;  %s5160_s14 = inlined_call_operand.vmem [shape: f32[2,1,128], index: 14, kind: input, shape index: {}]   ;;  %s5161_s15 = inlined_call_operand.vmem [shape: bf16[2,128,64], index: 15, kind: input, shape index: {}]   ;;  %s5162_s16 = inlined_call_operand.vmem [shape: f32[2,1,64], index: 16, kind: input, shape index: {}]   ;;  %s5163_s17 = inlined_call_operand.hbm [shape: f32[2,16,64], index: 17, kind: output, shape index: {}]  }
   0x1   :  { %5182 = sst [smem:[#allocation22_spill]] %s5146_s0 }
   0x2   :  { %5183 = sst [smem:[#allocation23_spill]] %s5147_s1 }
   0x3   :  { %5184 = sst [smem:[#allocation24_spill]] %s5148_s2 }
   0x4   :  { %5185 = sst [smem:[#allocation25_spill]] %s5149_s3 }
   0x5   :  { %5186 = sst [smem:[#allocation26_spill]] %s5150_s4 }
   0x6   :  { %5187 = sst [smem:[#allocation27_spill]] %s5151_s5 }
   0x7   :  { %5188 = sst [smem:[#allocation28_spill]] %s5152_s6 }
   0x8   :  { %5189 = sst [smem:[#allocation29_spill]] %s5153_s7 }
   0x9   :  { %5190 = sst [smem:[#allocation30_spill]] %s5154_s8 }
   0xa   :  { %5191 = sst [smem:[#allocation31_spill]] %s5157_s11 }
   0xb   :  { %5192 = sst [smem:[#allocation32_spill]] %s5160_s14 }
   0xc   :  { %5193 = sst [smem:[#allocation33_spill]] %s5161_s15 }
   0xd   :  { %5194 = sst [smem:[#allocation34_spill]] %s5162_s16 }
   0xe   :  { %5195 = sst [smem:[#allocation35_spill]] %s5163_s17 }
   0xf   :  { %22 = vsyncpa [#allocation4], 0 }
  0x10   :  { %24 = vsyncpa [#allocation4 + $0x1], 0  ;;  %s4181_s24 = smov 0   ;;  %s4183_s25 = smov 0  }
  0x11   :  { %s4185_s26 = smov 0   ;;  %s4187_s27 = smov 0  }
  0x12   :  { %s4189_s28 = smov 0   ;;  %s4191_s29 = smov 0  }
  0x13   :  { %s4193_s0 = smov 0   ;;  %s4195_s30 = smov 0  }
  0x14 LB: > { %5196 = sst [smem:[#allocation6_spill]] %s4034_s24  ;;  %s3322_s18 = sadd.s32 4294967295, %s4062_s30   ;;  %s4062_s30 = sphi %s4195_s30, %s30_s30   ;;  %s4058_s0 = sphi %s4193_s0, %s5269_s0   ;;  %s4054_s29 = sphi %s4191_s29, %s5268_s29   ;;  %s4050_s28 = sphi %s4189_s28, %s5267_s28   ;;  %s4046_s27 = sphi %s4187_s27, %s5266_s27   ;;  %s4042_s26 = sphi %s4185_s26, %s5265_s26   ;;  %s4038_s25 = sphi %s4183_s25, %s5264_s25   ;;  %s4034_s24 = sphi %s4181_s24, %s5263_s24  }
  0x15   : > { %5197 = sst [smem:[#allocation7_spill]] %s4038_s25  ;;  %s3323_s19 = sadd.s32 4294967294, %s4062_s30  }
  0x16   : > { %5198 = sst [smem:[#allocation8_spill]] %s4042_s26  ;;  %s39_s1 = sadd.s32 1, %s4054_s29 }
  0x17   : > { %5199 = sst [smem:[#allocation9_spill]] %s4046_s27  ;;  %p40_p0 = scmp.ge.s32.totalorder %s39_s1, 2 }
  0x18   : > { %5200 = sst [smem:[#allocation10_spill]] %s4050_s28  ;;  %s42_s20 = sadd.s32 1, %s4058_s0 }
  0x19   : > { %5201 = sst [smem:[#allocation11_spill]] %s4054_s29  ;;  %p501_p1 = scmp.ne.s32.totalorder %s4042_s26, %s4038_s25 }
  0x1a   : > { %5202 = sst [smem:[#allocation12_spill]] %s4058_s0  ;;  %p502_p2 = scmp.eq.s32.totalorder %s3322_s18, 3 }
  0x1b   : > { %5203 = sst [smem:[#allocation13_spill]] %s4062_s30  ;;  %s5271_s1 = smov (%p40_p0, %s39_s1), 0 }
  0x1c   : > { %5204 = sst [smem:[#allocation14_spill]] %s5271_s1  ;;  %s5273_s20 = smov (!%p40_p0, %s42_s20), %s4058_s0 }
  0x1d   : > { %p4230_p3 = por %p502_p2, %p501_p1  ;;  %p507_p4 = scmp.ne.s32.totalorder %s4038_s25, %s4034_s24 }
  0x1e   : > { %p44_p5 = scmp.ge.s32.totalorder %s5273_s20, 2  ;;  %p508_p6 = scmp.eq.s32.totalorder %s3323_s19, 3 }
  0x1f   : > { %s5205_s21 = scalar_select %p4230_p3, 1, 0 }
  0x20   : > { %p3326_p7 = scmp.ge.s32.totalorder %s4062_s30, 1  ;;  %p645_p8 = scmp.lt.s32.totalorder %s4062_s30, 5 }
  0x21   : > { %5206 = sst [smem:[#allocation15_spill]] %s5205_s21  ;;  %s5275_s20 = smov (%p44_p5, %s5273_s20), 0 }
  0x22   : > { %5207 = sst [smem:[#allocation16_spill]] %s5275_s20  ;;  %p4240_p9 = por %p508_p6, %p507_p4 }
  0x23   : > { %p646_p10 = pnand %p3326_p7, %p645_p8  ;;  %s488_s23 = ssub.s32 %s4058_s0, %s5275_s20 }
  0x24   : > { %s5208_s22 = scalar_select %p4240_p9, 1, 0 }
  0x25   : > { %s491_s18 = sadd.s32 1, %s4042_s26  ;;  %p489_p11 = scmp.eq.s32.totalorder %s488_s23, 0 }
  0x26   : > { %5209 = sst [smem:[#allocation17_spill]] %s5208_s22  ;;  %649 = sbr.rel (%p646_p10) target bundleno = 3705 (0xe79), region = 88 }
  0x27   : > { %s4248_s1 = scalar_select %p489_p11, %s4042_s26, %s491_s18  }
  0x29   : > { %5210 = sst [smem:[#allocation18_spill]] %s4248_s1 }
  0x2d   : > { %s5168_s19 = sand.u32 1, %s4038_s25   ;;  %p760_p12 = scmp.lt.s32.totalorder %s4050_s28, 1 }
  0x2e   : > { %s3327_s29 = sshll.u32 %s5168_s19, 4  ;;  %p773_p13 = scmp.lt.s32.totalorder %s4046_s27, 1 }
  0x2f   : > { %s4256_s24 = scalar_select %p760_p12, %s4050_s28, 1 }
  0x30   : > { %s4259_s20 = scalar_select %p773_p13, %s4046_s27, 1 }
  0x31   : > { %5211 = sst [smem:[#allocation19_spill]] %s4256_s24  ;;  %s3410_s23 = sshll.u32 %s4256_s24, 4 }
  0x32   : > { %s5213_s22 = sld [smem:[#allocation22_spill]]  ;;  %s5214_s25 = sld [smem:[#allocation23_spill]] }
  0x33   : > { %s3412_s27 = sshll.u32 %s4259_s20, 6  ;;  %s3334_s16 = sshll.u32 %s4259_s20, 1 }
  0x34   : > { %s5215_s3 = sld [smem:[#allocation25_spill]]  ;;  %s5217_s4 = sld [smem:[#allocation26_spill]] }
  0x35   : > { %s3413_s1 = sshll.u32 %s4259_s20, 5  ;;  %s5219_s5 = sld [smem:[#allocation27_spill]] }
  0x36   : > { %s3414_s24 = sshll.u32 %s4259_s20, 4  ;;  %s5221_s7 = sld [smem:[#allocation29_spill]] }
  0x37   : > { %s5222_s8 = sld [smem:[#allocation30_spill]]  ;;  %s5224_s18 = sld [smem:[#allocation32_spill]] }
  0x38   : > { %s4269_s30 = scalar_lea.vmem %s5213_s22, %s3410_s23  ;;  %s4274_s28 = scalar_lea.vmem %s5214_s25, %s3410_s23 }
  0x39   : > { %s5225_s22 = sld [smem:[#allocation33_spill]]  ;;  %s5226_s6 = sld [smem:[#allocation34_spill]] }
  0x3a   : > { %s4281_s0 = scalar_lea.vmem %s5215_s3, %s3412_s27  ;;  %s4286_s26 = scalar_lea.vmem %s5217_s4, %s3334_s16 }
  0x3b   : > { %5216 = sst [smem:[#allocation20_spill]] %s4281_s0  ;;  %s4296_s23 = scalar_lea.vmem %s5219_s5, %s3413_s1 }
  0x3c   : > { %5220 = sst [smem:[#allocation21_spill]] %s4296_s23  ;;  %s4302_s3 = scalar_lea.vmem %s5221_s7, %s3414_s24 }
  0x3d   : > { %s4307_s16 = scalar_lea.vmem %s5222_s8, %s3414_s24  ;;  %s811_s7 = scalar_lea.vmem %s5158_s12, %s4259_s20 }
  0x3e   : > { %s4328_s24 = scalar_lea.vmem %s5159_s13, %s3413_s1  ;;  %s819_s2 = scalar_lea.vmem %s5224_s18, %s4259_s20 }
  0x3f   : > { %s4337_s25 = scalar_lea.vmem %s5225_s22, %s3412_s27  ;;  %s827_s11 = scalar_lea.vmem %s5226_s6, %s4259_s20 }
  0x40   : > { %s4343_s14 = scalar_lea.vmem [#allocation3], %s3327_s29  ;;  %s5227_s15 = sld [smem:[#allocation9_spill]] }
  0x46   : > { %p3345_p0 = scmp.ne.s32.totalorder %s5227_s15, 0 }
  0x47   : > { %v835_v0 = vld [vmem:[%s4274_s28] sm:$0xff] (!%p3345_p0)  ;;  %v4064_v1 = vmov (!%p3345_p0), 0   ;;  %v836_v2 = vld [vmem:[%s4274_s28 + $0x8] sm:$0xff] (!%p3345_p0)  ;;  %vm849_vm0 = vcmask (!%p3345_p0), 523264  }
  0x48   : > { %832 = sbr.rel (%p3345_p0) target bundleno = 208 (0xd0), region = 92  ;;  %3762 = vset.pattern.permute.xlu0 (!%p3345_p0), %v4064_v1  ;;  %v833_v3 = vld [vmem:[%s4269_s30] sm:$0xff] (!%p3345_p0)  ;;  %v834_v6 = vld [vmem:[%s4269_s30 + $0x8] sm:$0xff] (!%p3345_p0) }
  0x49   : > { %839 = vperm.xlu0 (!%p3345_p0), %3762, %v835_v0  }
  0x4d   : > { %844 = vperm.xlu0 (!%p3345_p0), %3762, %v836_v2  }
  0xc8   : > { %v840_v4 = vpop.permute.xlu0 %839 }
  0xc9   : > { %v847_v5 = vmul.f32 %v840_v4, %v833_v3 }
  0xcb   : > { %850 = vst.msk [vmem:[#allocation2] sm:$0xff] %vm849_vm0, %v847_v5 }
  0xcc   : > { %v845_v7 = vpop.permute.xlu0 %844 }
  0xcd   : > { %v848_v8 = vmul.f32 %v845_v7, %v834_v6 }
  0xcf   : > { %851 = vst.msk [vmem:[#allocation2 + $0x8] sm:$0xff] %vm849_vm0, %v848_v8 }
  0xd0 PF: > { %s5228_s6 = sld [smem:[#allocation20_spill]]  ;;  %v4065_v11 = vmov 0   ;;  %v4066_v13 = vmov 0.0   ;;  %vm1059_vm1 = vcmask 130048   ;;  %v3906_v17 = vld [vmem:[%s4302_s3] sm:$0xff]   ;;  %vm938_vm2 = vcmask 523264   ;;  %s5248_s22 = scalar_lea.vmem %s5156_s10, %s4259_s20 }
  0xd1   : > { %974 = vmatprep.mubr.bf16.mxu0 %v4065_v11  ;;  %3763 = vset.pattern.permute.xlu0 %v4065_v11  ;;  %v4360_v19 = vsel %vm1059_vm1, %v3906_v17, 0  ;;  %v3907_v24 = vld [vmem:[%s4302_s3 + $0x8] sm:$0xff]   ;;  %vm4067_vm3 = vmmov 0   ;;  %v888_v26 = vlaneseq  ;;  %v886_v29 = vld [vmem:[%s4286_s26] sm:$0x3]  ;;  %s4068_s3 = smov 96  }
  0xd2   : > { %3481 = vmatprep.subr.bf16.mxu1 %v4066_v13  ;;  %v852_v21 = vld [vmem:[#allocation2] sm:$0xff]  ;;  %v4371_v25 = vsel %vm1059_vm1, %v3907_v24, 0  ;;  %3485 = vmatprep.mubr.msk.bf16.mxu1 %vm4067_vm3, %v4066_v13  ;;  %s4069_s8 = smov 112   ;;  %s4070_s27 = smov 80   ;;  %vm1303_vm4 = vcmask 244736   ;;  %vm1380_vm6 = vcmask 236544  }
  0xd3   : > { %3482 = vmatpush3.bf16.xpose.msra.mxu1 %v4360_v19  ;;  %v4381_v27 = vshrl.u32 %v888_v26, 7  ;;  %s4071_s29 = smov 64   ;;  %s4072_s30 = smov 30   ;;  %vm1457_vm9 = vcmask 220160   ;;  %vm1534_vm12 = vcmask 187392   ;;  %vm1911_vm0 = vcmask 7168  }
  0xd4   : > { %3483 = vmatprep.subr.bf16.mxu1 %v4066_v13  ;;  %s4073_s26 = smov 127   ;;  %s4074_s1 = smov 29  }
  0xd5   : > { %v890_v28 = vsub.s32 0, %v4381_v27  ;;  %v894_v30 = vsub.s32 1, %v4381_v27  ;;  %s4075_s23 = smov 126   ;;  %s4076_s0 = smov 27  }
  0xd6   : > { %v3894_v9 = vld [vmem:[%s5228_s6 + $0x4] ss:$8 sps:$4 sm:$0xff]   ;;  %v3896_v10 = vld [vmem:[%s5228_s6] ss:$8 sps:$4 sm:$0xff]   ;;  %v3897_v12 = vld [vmem:[%s5228_s6 + $0x14] ss:$8 sps:$4 sm:$0xff]  }
  0xd7   : > { %942 = vmatprep.subr.bf16.mxu0 %v3894_v9  ;;  %v3899_v14 = vld [vmem:[%s5228_s6 + $0x10] ss:$8 sps:$4 sm:$0xff]   ;;  %v3900_v15 = vld [vmem:[%s5228_s6 + $0x24] ss:$8 sps:$4 sm:$0xff]   ;;  %v3902_v16 = vld [vmem:[%s5228_s6 + $0x20] ss:$8 sps:$4 sm:$0xff]   ;;  %v891_v31 = vrot.slane %v886_v29, %v890_v28  ;;  %v895_v33 = vrot.slane %v886_v29, %v894_v30 }
  0xd8   : > { %943 = vmatpush1.bf16.msra.mxu0 %v3896_v10  ;;  %v3903_v18 = vld [vmem:[%s5228_s6 + $0x34] ss:$8 sps:$4 sm:$0xff]   ;;  %v3905_v20 = vld [vmem:[%s5228_s6 + $0x30] ss:$8 sps:$4 sm:$0xff]   ;;  %v853_v22 = vld [vmem:[#allocation2 + $0x8] sm:$0xff]  ;;  %s4077_s19 = smov 124  }
  0xd9   : > { %944 = vmatprep.subr.bf16.mxu0 %v3897_v12  ;;  %v877_v23 = vpack.c.bf16 %v853_v22, %v852_v21  ;;  %v4455_v22 = vsub.s32 15, %v4381_v27  ;;  %s4078_s4 = smov 120   ;;  %s4079_s18 = smov 23  }
  0xda   : > { %s5240_s5 = sld [smem:[#allocation24_spill]]  ;;  %s4080_s15 = smov 98  }
  0xdb   : > { %3484 = vmatpush3.bf16.xpose.msra.mxu1 %v4371_v25  ;;  %s4081_s6 = smov 1  }
  0xdc   : > { %945 = vmatpush1.bf16.msra.mxu0 %v3899_v14  ;;  %3497 = vmatprep.subr.bf16.mxu1 %v4066_v13 }
  0xdd   : > { %946 = vmatprep.subr.bf16.mxu0 %v3900_v15 }
  0xe0   : > { %947 = vmatpush1.bf16.msra.mxu0 %v3902_v16 }
  0xe1   : > { %948 = vmatprep.subr.bf16.mxu0 %v3903_v18 }
  0xe4   : > { %949 = vmatpush1.bf16.msra.mxu0 %v3905_v20 }
  0xe5   : > { %3489 = vmatprep.subr.bf16.mxu0 %v4066_v13 }
  0xe7   : > { %3355 = vmatmul.mubr.msk.bf16.vlgmr.msra.gmra.mrb[0].mxu0 %vm938_vm2, %v877_v23  ;;  %v1312_v23 = vand.u32 1, %v4455_v22 }
  0xe8   : > { %3493 = vmatprep.mubr.msk.bf16.mxu0 %vm4067_vm3, %v4066_v13 }
  0xe9   : > { %vm4461_vm5 = vcmp.ne.s32.totalorder %v1312_v23, 0 }
  0xed   : > { %3490 = vmatpush3.bf16.xpose.msra.mxu0 %v4360_v19 }
  0xee   : > { %3491 = vmatprep.subr.bf16.mxu0 %v4066_v13 }
  0xf5   : > { %3492 = vmatpush3.bf16.xpose.msra.mxu0 %v4371_v25 }
  0xf6   : > { %3505 = vmatprep.subr.bf16.mxu0 %v4066_v13 }
 0x1ba   : > { %v976_v32 = vpop.f32.mrb[0].mxu0 }
 0x1bb   : > { %v977_v34 = vadd.f32 %v976_v32, %v891_v31  ;;  %v978_v35 = vpop.f32.mrb[1].mxu0 }
 0x1bc   : > { %v980_v36 = vpop.f32.mrb[2].mxu0  ;;  %v4388_v39 = vadd.f32 %v978_v35, %v895_v33 }
 0x1bd   : > { %v981_v37 = vadd.f32 %v980_v36, %v891_v31  ;;  %v982_v38 = vpop.f32.mrb[3].mxu0  ;;  %993 = vrot.lane.b32.xlu1 %v977_v34, %s4068_s3  ;;  %987 = vrot.lane.b32.xlu0 %v977_v34, %s4069_s8  ;;  %v1005_v41 = vmul.f32 0.25, %v977_v34 }
 0x1be   : > { %v4390_v40 = vadd.f32 %v982_v38, %v895_v33 }
 0x1bf   : > { %v1006_v42 = vmul.f32 0.25, %v981_v37  ;;  %v1017_v43 = vpack.c.bf16 %v981_v37, %v977_v34 }
 0x1c0   : > { %v4394_v44 = vpack.i.bf16 %v4390_v40, %v4388_v39  ;;  %v1041_v45 = vpack.c.bf16 %v4390_v40, %v4388_v39 }
 0x1c1   : > { %995 = vrot.lane.b32.xlu1 %v981_v37, %s4068_s3  ;;  %989 = vrot.lane.b32.xlu0 %v981_v37, %s4069_s8  ;;  %v1013_v46 = vpack.c.bf16 %v1006_v42, %v1005_v41 }
 0x1c3   : > { %3486 = vmatmul.mubr.msk.bf16.vlgmr.msra.gmra.mrb[0].mxu1 %vm1059_vm1, %v1013_v46 }
 0x1c4   : > { %3498 = vmatpush3.bf16.xpose.msra.mxu1 %v4360_v19  ;;  %3501 = vmatprep.mubr.msk.bf16.mxu1 %vm4067_vm3, %v4066_v13 }
 0x1c5   : > { %1001 = vrot.lane.b32.xlu1 %v981_v37, %s4070_s27  ;;  %999 = vrot.lane.b32.xlu0 %v977_v34, %s4070_s27 }
 0x1c6   : > { %3499 = vmatprep.subr.bf16.mxu1 %v4066_v13 }
 0x1c9   : > { %1556 = vrot.lane.b32.xlu0 %v1017_v43, %s4071_s29 }
 0x1cc   : > { %3500 = vmatpush3.bf16.xpose.msra.mxu1 %v4371_v25 }
 0x1cd   : > { %3519 = vmatprep.subr.bf16.mxu1 %v4066_v13 }
 0x22f   : > { %v994_v47 = vpop.permute.xlu1 %993  ;;  %v988_v48 = vpop.permute.xlu0 %987 }
 0x230   : > { %v1009_v49 = vmul.f32 0.25, %v994_v47  ;;  %v1007_v50 = vmul.f32 0.25, %v988_v48 }
 0x233   : > { %v996_v51 = vpop.permute.xlu1 %995  ;;  %v990_v52 = vpop.permute.xlu0 %989 }
 0x234   : > { %v1010_v53 = vmul.f32 0.25, %v996_v51  ;;  %v1019_v54 = vpack.c.bf16 %v996_v51, %v994_v47  ;;  %v1008_v55 = vmul.f32 0.25, %v990_v52  ;;  %v1018_v56 = vpack.c.bf16 %v990_v52, %v988_v48 }
 0x236   : > { %v1015_v57 = vpack.c.bf16 %v1010_v53, %v1009_v49  ;;  %v1014_v58 = vpack.c.bf16 %v1008_v55, %v1007_v50  ;;  %1603 = vrot.lane.b32.xlu1 %v1018_v56, %s4071_s29  ;;  %1650 = vrot.lane.b32.xlu0 %v1019_v54, %s4071_s29 }
 0x237   : > { %v1002_v59 = vpop.permute.xlu1 %1001  ;;  %v1000_v60 = vpop.permute.xlu0 %999 }
 0x238   : > { %v1020_v61 = vpack.c.bf16 %v1002_v59, %v1000_v60  ;;  %3494 = vmatmul.mubr.msk.bf16.vlgmr.msra.gmra.mrb[4].mxu0 %vm1059_vm1, %v1014_v58  ;;  %3502 = vmatmul.mubr.msk.bf16.vlgmr.msra.gmra.mrb[4].mxu1 %vm1059_vm1, %v1015_v57  ;;  %v1012_v62 = vmul.f32 0.25, %v1002_v59  ;;  %v1011_v63 = vmul.f32 0.25, %v1000_v60 }
 0x239   : > { %3506 = vmatpush3.bf16.xpose.msra.mxu0 %v4360_v19  ;;  %3509 = vmatprep.mubr.msk.bf16.mxu0 %vm4067_vm3, %v4066_v13 }
 0x23a   : > { %1697 = vrot.lane.b32.xlu1 %v1020_v61, %s4071_s29  ;;  %3507 = vmatprep.subr.bf16.mxu0 %v4066_v13  ;;  %v1016_v1 = vpack.c.bf16 %v1012_v62, %v1011_v63  ;;  %s4082_s29 = smov 2  }
 0x23b   : > { %3521 = vmatprep.mubr.msk.bf16.mxu1 %vm4067_vm3, %v4066_v13  ;;  %v1557_v0 = vpop.permute.xlu0 %1556 }
 0x23c   : > { %v1559_v2 = vsel %vm1059_vm1, %v1557_v0, 0 }
 0x241   : > { %3508 = vmatpush3.bf16.xpose.msra.mxu0 %v4371_v25 }
 0x242   : > { %3513 = vmatprep.subr.bf16.mxu0 %v4066_v13 }
 0x248   : > { %3510 = vmatmul.mubr.msk.bf16.vlgmr.msra.gmra.mrb[8].mxu0 %vm1059_vm1, %v1016_v1 }
 0x249   : > { %3514 = vmatpush3.bf16.xpose.msra.mxu0 %v1559_v2  ;;  %3515 = vmatprep.mubr.msk.bf16.mxu0 %vm4067_vm3, %v4066_v13  ;;  %v1389_v2 = vand.u32 2, %v4455_v22 }
 0x24a   : > { %3525 = vmatprep.subr.bf16.mxu0 %v4066_v13 }
 0x24b   : > { %vm4512_vm7 = vcmp.ne.s32.totalorder %v1389_v2, 0 }
 0x250   : > { %3516 = vmatmul.mubr.msk.bf16.vlgmr.msra.gmra.mrb[12].mxu0 %vm1059_vm1, %v1013_v46 }
 0x251   : > { %3527 = vmatprep.mubr.msk.bf16.mxu0 %vm4067_vm3, %v4066_v13 }
 0x296   : > { %v1103_v3 = vpop.f32.mrb[0].mxu1 }
 0x297   : > { %1279 = vrot.lane.b32.xlu1 %v1103_v3, %s4072_s30  ;;  %1255 = vrot.lane.b32.xlu0 %v1103_v3, %s4073_s26  ;;  %v3487_v4 = vpop.f32.mrb[1].mxu1 }
 0x298   : > { %v4429_v5 = vpop.f32.mrb[2].mxu1 }
 0x299   : > { %v3488_v6 = vpop.f32.mrb[3].mxu1 }
 0x2a8   : > { %v1604_v7 = vpop.permute.xlu1 %1603  ;;  %v1651_v8 = vpop.permute.xlu0 %1650 }
 0x2a9   : > { %v1606_v9 = vsel %vm1059_vm1, %v1604_v7, 0  ;;  %v1653_v10 = vsel %vm1059_vm1, %v1651_v8, 0 }
 0x2aa   : > { %3520 = vmatpush3.bf16.xpose.msra.mxu1 %v1606_v9  ;;  %3526 = vmatpush3.bf16.xpose.msra.mxu0 %v1653_v10 }
 0x2ab   : > { %3531 = vmatprep.subr.bf16.mxu1 %v4066_v13  ;;  %3537 = vmatprep.subr.bf16.mxu0 %v4066_v13 }
 0x2ac   : > { %v1698_v11 = vpop.permute.xlu1 %1697 }
 0x2ad   : > { %v1700_v12 = vsel %vm1059_vm1, %v1698_v11, 0 }
 0x2b1   : > { %3522 = vmatmul.mubr.msk.bf16.vlgmr.msra.gmra.mrb[8].mxu1 %vm1059_vm1, %v1014_v58  ;;  %3528 = vmatmul.mubr.msk.bf16.vlgmr.msra.gmra.mrb[16].mxu0 %vm1059_vm1, %v1015_v57 }
 0x2b2   : > { %3532 = vmatpush3.bf16.xpose.msra.mxu1 %v1700_v12  ;;  %3533 = vmatprep.mubr.msk.bf16.mxu1 %vm4067_vm3, %v4066_v13 }
 0x2b3   : > { %3545 = vmatprep.subr.bf16.mxu1 %v4066_v13  ;;  %3541 = vmatprep.mubr.msk.bf16.mxu0 %vm4067_vm3, %v4066_v13 }
 0x2b9   : > { %3534 = vmatmul.mubr.msk.bf16.vlgmr.msra.gmra.mrb[12].mxu1 %vm1059_vm1, %v1016_v1 }
 0x2ba   : > { %3549 = vmatprep.mubr.msk.bf16.mxu1 %vm4067_vm3, %v4066_v13 }
 0x309   : > { %v1280_v24 = vpop.permute.xlu1 %1279  ;;  %v1256_v25 = vpop.permute.xlu0 %1255 }
 0x30a   : > { %v1304_v28 = vsel %vm1303_vm4, %v1256_v25, %v1280_v24 }
 0x30b   : > { %v1147_v14 = vpop.f32.mrb[4].mxu0  ;;  %v1191_v15 = vpop.f32.mrb[4].mxu1  ;;  %v1316_v33 = vsel %vm4461_vm5, %v1304_v28, %v1103_v3 }
 0x30c   : > { %v3495_v16 = vpop.f32.mrb[5].mxu0  ;;  %1283 = vrot.lane.b32.xlu1 %v1147_v14, %s4072_s30  ;;  %1259 = vrot.lane.b32.xlu0 %v1147_v14, %s4073_s26  ;;  %v3503_v17 = vpop.f32.mrb[5].mxu1 }
 0x30d   : > { %v4448_v18 = vpop.f32.mrb[6].mxu0  ;;  %v4450_v19 = vpop.f32.mrb[6].mxu1 }
 0x30e   : > { %v3496_v20 = vpop.f32.mrb[7].mxu0  ;;  %v3504_v21 = vpop.f32.mrb[7].mxu1 }
 0x30f   : > { %v1244_v20 = vadd.s32 8, %v4381_v27 }
 0x310   : > { %1287 = vrot.lane.b32.xlu1 %v1191_v15, %s4072_s30  ;;  %1263 = vrot.lane.b32.xlu0 %v1191_v15, %s4073_s26 }
 0x311   : > { %v4547_v21 = vsub.s32 15, %v1244_v20 }
 0x313   : > { %v1313_v23 = vand.u32 1, %v4547_v21 }
 0x315   : > { %vm4559_vm8 = vcmp.ne.s32.totalorder %v1313_v23, 0 }
 0x31b   : > { %v1235_v26 = vpop.f32.mrb[8].mxu0 }
 0x31c   : > { %v3511_v29 = vpop.f32.mrb[9].mxu0  ;;  %1291 = vrot.lane.b32.xlu1 %v1235_v26, %s4072_s30  ;;  %1267 = vrot.lane.b32.xlu0 %v1235_v26, %s4073_s26 }
 0x31d   : > { %v4465_v31 = vpop.f32.mrb[10].mxu0 }
 0x31e   : > { %v3512_v32 = vpop.f32.mrb[11].mxu0 }
 0x320   : > { %1356 = vrot.lane.b32.xlu1 %v1316_v33, %s4074_s1  ;;  %1332 = vrot.lane.b32.xlu0 %v1316_v33, %s4075_s23 }
 0x323   : > { %v4471_v34 = vpop.f32.mrb[12].mxu0 }
 0x324   : > { %v3517_v35 = vpop.f32.mrb[13].mxu0 }
 0x325   : > { %v4473_v36 = vpop.f32.mrb[14].mxu0 }
 0x326   : > { %v3518_v37 = vpop.f32.mrb[15].mxu0 }
 0x37e   : > { %v1284_v38 = vpop.permute.xlu1 %1283  ;;  %v1260_v41 = vpop.permute.xlu0 %1259 }
 0x37f   : > { %v1306_v42 = vsel %vm1303_vm4, %v1260_v41, %v1284_v38  ;;  %v1466_v38 = vand.u32 4, %v4455_v22 }
 0x380   : > { %v1318_v43 = vsel %vm4461_vm5, %v1306_v42, %v1147_v14 }
 0x381   : > { %1360 = vrot.lane.b32.xlu1 %v1318_v43, %s4074_s1  ;;  %1336 = vrot.lane.b32.xlu0 %v1318_v43, %s4075_s23  ;;  %vm4576_vm10 = vcmp.ne.s32.totalorder %v1466_v38, 0 }
 0x382   : > { %v1288_v46 = vpop.permute.xlu1 %1287  ;;  %v1264_v47 = vpop.permute.xlu0 %1263 }
 0x383   : > { %v1308_v48 = vsel %vm1303_vm4, %v1264_v47, %v1288_v46 }
 0x384   : > { %v4481_v49 = vpop.f32.mrb[8].mxu1  ;;  %v4483_v50 = vpop.f32.mrb[16].mxu0  ;;  %v1320_v51 = vsel %vm4461_vm5, %v1308_v48, %v1191_v15 }
 0x385   : > { %v3529_v52 = vpop.f32.mrb[17].mxu0  ;;  %1364 = vrot.lane.b32.xlu1 %v1320_v51, %s4074_s1  ;;  %1340 = vrot.lane.b32.xlu0 %v1320_v51, %s4075_s23  ;;  %v3523_v53 = vpop.f32.mrb[9].mxu1 }
 0x386   : > { %v4489_v54 = vpop.f32.mrb[10].mxu1  ;;  %v4491_v55 = vpop.f32.mrb[18].mxu0 }
 0x387   : > { %v3524_v56 = vpop.f32.mrb[11].mxu1  ;;  %v3530_v57 = vpop.f32.mrb[19].mxu0 }
 0x38c   : > { %v4493_v58 = vpop.f32.mrb[12].mxu1 }
 0x38d   : > { %v3535_v59 = vpop.f32.mrb[13].mxu1 }
 0x38e   : > { %v1292_v60 = vpop.permute.xlu1 %1291  ;;  %v1268_v61 = vpop.permute.xlu0 %1267 }
 0x38f   : > { %v1310_v62 = vsel %vm1303_vm4, %v1268_v61, %v1292_v60  ;;  %v4496_v63 = vpop.f32.mrb[14].mxu1 }
 0x390   : > { %v3536_v0 = vpop.f32.mrb[15].mxu1  ;;  %v1322_v1 = vsel %vm4461_vm5, %v1310_v62, %v1235_v26  ;;  %v855_v62 = vld [vmem:[%s4274_s28 + $0x8] sm:$0xff] }
 0x391   : > { %1368 = vrot.lane.b32.xlu1 %v1322_v1, %s4074_s1  ;;  %1344 = vrot.lane.b32.xlu0 %v1322_v1, %s4075_s23 }
 0x392   : > { %v1357_v3 = vpop.permute.xlu1 %1356  ;;  %v1333_v4 = vpop.permute.xlu0 %1332 }
 0x393   : > { %v1381_v6 = vsel %vm1380_vm6, %v1333_v4, %v1357_v3  ;;  %v1390_v3 = vand.u32 2, %v4547_v21 }
 0x394   : > { %v1393_v8 = vsel %vm4512_vm7, %v1381_v6, %v1316_v33  ;;  %v854_v33 = vld [vmem:[%s4274_s28] sm:$0xff]  ;;  %s5239_s28 = sld [smem:[#allocation19_spill]] }
 0x395   : > { %1281 = vrot.lane.b32.xlu1 %v4429_v5, %s4072_s30  ;;  %1257 = vrot.lane.b32.xlu0 %v4429_v5, %s4073_s26  ;;  %vm4600_vm11 = vcmp.ne.s32.totalorder %v1390_v3, 0 }
 0x399   : > { %1285 = vrot.lane.b32.xlu1 %v4448_v18, %s4072_s30  ;;  %1261 = vrot.lane.b32.xlu0 %v4448_v18, %s4073_s26 }
 0x39a   : > { %s5241_s21 = scalar_lea.vmem %s5240_s5, %s5239_s28 }
 0x39d   : > { %1433 = vrot.lane.b32.xlu1 %v1393_v8, %s4076_s0  ;;  %1409 = vrot.lane.b32.xlu0 %v1393_v8, %s4077_s19 }
 0x3a1   : > { %1289 = vrot.lane.b32.xlu1 %v4450_v19, %s4072_s30  ;;  %1265 = vrot.lane.b32.xlu0 %v4450_v19, %s4073_s26 }
 0x3a5   : > { %1293 = vrot.lane.b32.xlu1 %v4465_v31, %s4072_s30  ;;  %1269 = vrot.lane.b32.xlu0 %v4465_v31, %s4073_s26  ;;  %s4083_s30 = smov 99   ;;  %s4084_s26 = smov 4  }
 0x3f3   : > { %v1361_v9 = vpop.permute.xlu1 %1360  ;;  %v1337_v10 = vpop.permute.xlu0 %1336 }
 0x3f4   : > { %v1383_v11 = vsel %vm1380_vm6, %v1337_v10, %v1361_v9 }
 0x3f5   : > { %v4531_v12 = vsel %vm4512_vm7, %v1383_v11, %v1318_v43 }
 0x3f6   : > { %1437 = vrot.lane.b32.xlu1 %v4531_v12, %s4076_s0  ;;  %1413 = vrot.lane.b32.xlu0 %v4531_v12, %s4077_s19 }
 0x3f7   : > { %v1365_v14 = vpop.permute.xlu1 %1364  ;;  %v1341_v15 = vpop.permute.xlu0 %1340 }
 0x3f8   : > { %v1385_v16 = vsel %vm1380_vm6, %v1341_v15, %v1365_v14 }
 0x3f9   : > { %v4540_v17 = vsel %vm4512_vm7, %v1385_v16, %v1320_v51 }
 0x3fa   : > { %1441 = vrot.lane.b32.xlu1 %v4540_v17, %s4076_s0  ;;  %1417 = vrot.lane.b32.xlu0 %v4540_v17, %s4077_s19 }
 0x403   : > { %v1369_v24 = vpop.permute.xlu1 %1368  ;;  %v1345_v25 = vpop.permute.xlu0 %1344 }
 0x404   : > { %v1387_v26 = vsel %vm1380_vm6, %v1345_v25, %v1369_v24 }
 0x405   : > { %v4553_v28 = vsel %vm4512_vm7, %v1387_v26, %v1322_v1 }
 0x406   : > { %1445 = vrot.lane.b32.xlu1 %v4553_v28, %s4076_s0  ;;  %1421 = vrot.lane.b32.xlu0 %v4553_v28, %s4077_s19 }
 0x407   : > { %v1282_v29 = vpop.permute.xlu1 %1281  ;;  %v1258_v32 = vpop.permute.xlu0 %1257 }
 0x408   : > { %v1305_v35 = vsel %vm1303_vm4, %v1258_v32, %v1282_v29 }
 0x409   : > { %v1317_v37 = vsel %vm4559_vm8, %v1305_v35, %v4429_v5 }
 0x40a   : > { %1334 = vrot.lane.b32.xlu1 %v1317_v37, %s4075_s23  ;;  %859 = vperm.xlu0 %3763, %v854_v33  }
 0x40b   : > { %v1286_v41 = vpop.permute.xlu1 %1285  ;;  %v1262_v42 = vpop.permute.xlu0 %1261 }
 0x40c   : > { %v1307_v43 = vsel %vm1303_vm4, %v1262_v42, %v1286_v41  ;;  %v3346_v42 = vld [vmem:[%s5241_s21] ss:$0 sm:$0xff] }
 0x40d   : > { %v1319_v46 = vsel %vm4559_vm8, %v1307_v43, %v4448_v18 }
 0x40e   : > { %1358 = vrot.lane.b32.xlu1 %v1317_v37, %s4074_s1  ;;  %1338 = vrot.lane.b32.xlu0 %v1319_v46, %s4075_s23 }
 0x40f   : > { %v1434_v47 = vpop.permute.xlu1 %1433  ;;  %v1410_v48 = vpop.permute.xlu0 %1409 }
 0x410   : > { %v1458_v22 = vsel %vm1457_vm9, %v1410_v48, %v1434_v47 }
 0x411   : > { %v1470_v51 = vsel %vm4576_vm10, %v1458_v22, %v1393_v8 }
 0x412   : > { %1362 = vrot.lane.b32.xlu1 %v1319_v46, %s4074_s1  ;;  %1486 = vrot.lane.b32.xlu0 %v1470_v51, %s4078_s4 }
 0x413   : > { %v1290_v18 = vpop.permute.xlu1 %1289  ;;  %v1266_v52 = vpop.permute.xlu0 %1265 }
 0x414   : > { %v1309_v53 = vsel %vm1303_vm4, %v1266_v52, %v1290_v18 }
 0x415   : > { %v1321_v56 = vsel %vm4559_vm8, %v1309_v53, %v4450_v19 }
 0x416   : > { %1510 = vrot.lane.b32.xlu1 %v1470_v51, %s4079_s18  ;;  %1342 = vrot.lane.b32.xlu0 %v1321_v56, %s4075_s23 }
 0x417   : > { %v1294_v57 = vpop.permute.xlu1 %1293  ;;  %v1270_v59 = vpop.permute.xlu0 %1269 }
 0x418   : > { %v1311_v60 = vsel %vm1303_vm4, %v1270_v59, %v1294_v57  ;;  %vm1984_vm4 = vcmask 15360  }
 0x419   : > { %v1323_v61 = vsel %vm4559_vm8, %v1311_v60, %v4465_v31 }
 0x41a   : > { %1366 = vrot.lane.b32.xlu1 %v1321_v56, %s4074_s1  ;;  %1346 = vrot.lane.b32.xlu0 %v1323_v61, %s4075_s23  ;;  %s4088_s23 = smov 105  }
 0x41e   : > { %1370 = vrot.lane.b32.xlu1 %v1323_v61, %s4074_s1  ;;  %864 = vperm.xlu0 %3763, %v855_v62   ;;  %s4085_s1 = smov 101  }
 0x468   : > { %v1438_v19 = vpop.permute.xlu1 %1437  ;;  %v1414_v2 = vpop.permute.xlu0 %1413 }
 0x469   : > { %v1460_v24 = vsel %vm1457_vm9, %v1414_v2, %v1438_v19 }
 0x46a   : > { %v1472_v26 = vsel %vm4576_vm10, %v1460_v24, %v4531_v12 }
 0x46c   : > { %v1442_v0 = vpop.permute.xlu1 %1441  ;;  %v1418_v8 = vpop.permute.xlu0 %1417 }
 0x46d   : > { %v1462_v29 = vsel %vm1457_vm9, %v1418_v8, %v1442_v0 }
 0x46e   : > { %v1474_v33 = vsel %vm4576_vm10, %v1462_v29, %v4540_v17 }
 0x478   : > { %v1446_v1 = vpop.permute.xlu1 %1445  ;;  %v1422_v11 = vpop.permute.xlu0 %1421 }
 0x479   : > { %v1464_v35 = vsel %vm1457_vm9, %v1422_v11, %v1446_v1 }
 0x47a   : > { %v1476_v38 = vsel %vm4576_vm10, %v1464_v35, %v4553_v28 }
 0x47c   : > { %v1335_v4 = vpop.permute.xlu1 %1334 }
 0x480   : > { %v1359_v31 = vpop.permute.xlu1 %1358 }
 0x481   : > { %v1382_v9 = vsel %vm1380_vm6, %v1335_v4, %v1359_v31 }
 0x482   : > { %v1394_v10 = vsel %vm4600_vm11, %v1382_v9, %v1317_v37 }
 0x483   : > { %1411 = vrot.lane.b32.xlu1 %v1394_v10, %s4077_s19  ;;  %1435 = vrot.lane.b32.xlu0 %v1394_v10, %s4076_s0 }
 0x484   : > { %v1363_v15 = vpop.permute.xlu1 %1362 }
 0x488   : > { %v1511_v32 = vpop.permute.xlu1 %1510 }
 0x489   : > { %v4609_v14 = vpop.permute.xlu0 %859 }
 0x48a   : > { %v873_v43 = vmul.f32 %v3346_v42, %v4609_v14 }
 0x48c   : > { %v1367_v12 = vpop.permute.xlu1 %1366  ;;  %vm875_vm13 = vcmp.ne.f32.partialorder %v873_v43, 0.0 }
 0x48d   : > { %v1339_v16 = vpop.permute.xlu0 %1338 }
 0x48e   : > { %v1384_v20 = vsel %vm1380_vm6, %v1339_v16, %v1363_v15 }
 0x48f   : > { %v1396_v23 = vsel %vm4600_vm11, %v1384_v20, %v1319_v46 }
 0x490   : > { %1439 = vrot.lane.b32.xlu0 %v1396_v23, %s4076_s0  ;;  %1415 = vrot.lane.b32.xlu1 %v1396_v23, %s4077_s19  ;;  %v1371_v51 = vpop.permute.xlu1 %1370 }
 0x491   : > { %v1487_v25 = vpop.permute.xlu0 %1486 }
 0x492   : > { %v1535_v28 = vsel %vm1534_vm12, %v1487_v25, %v1511_v32 }
 0x493   : > { %v1596_v46 = vadd.f32 %v4471_v34, %v1535_v28  ;;  %v1467_v34 = vand.u32 4, %v4547_v21 }
 0x494   : > { %1490 = vrot.lane.b32.xlu0 %v1472_v26, %s4078_s4  ;;  %1514 = vrot.lane.b32.xlu1 %v1472_v26, %s4079_s18 }
 0x495   : > { %v1343_v37 = vpop.permute.xlu0 %1342  ;;  %v1747_v47 = vsel %vm875_vm13, %v1596_v46, -10000.0  ;;  %vm4663_vm14 = vcmp.ne.s32.totalorder %v1467_v34, 0 }
 0x496   : > { %v1386_v41 = vsel %vm1380_vm6, %v1343_v37, %v1367_v12  ;;  %v1755_v48 = vsel %vm1059_vm1, %v1747_v47, -inf }
 0x497   : > { %v4637_v17 = vsel %vm4600_vm11, %v1386_v41, %v1321_v56 }
 0x498   : > { %1494 = vrot.lane.b32.xlu0 %v1474_v33, %s4078_s4  ;;  %1518 = vrot.lane.b32.xlu1 %v1474_v33, %s4079_s18 }
 0x499   : > { %v1347_v22 = vpop.permute.xlu0 %1346 }
 0x49a   : > { %v1388_v18 = vsel %vm1380_vm6, %v1347_v22, %v1371_v51  ;;  %vm2171_vm6 = vcmask 1047552  }
 0x49b   : > { %v4656_v52 = vsel %vm4600_vm11, %v1388_v18, %v1323_v61 }
 0x49c   : > { %1498 = vrot.lane.b32.xlu0 %v1476_v38, %s4078_s4  ;;  %1522 = vrot.lane.b32.xlu1 %v1476_v38, %s4079_s18  ;;  %s5247_s18 = scalar_lea.vmem %s5155_s9, %s4259_s20 }
 0x49d   : > { %v4661_v53 = vpop.permute.xlu0 %864 }
 0x4a0   : > { %1419 = vrot.lane.b32.xlu0 %v4637_v17, %s4077_s19 }
 0x4c0   : > { %1756 = vmax.xlane.f32.xlu1 %v1755_v48 }
 0x4d1   : > { %1443 = vrot.lane.b32.xlu1 %v4637_v17, %s4076_s0 }
 0x4d5   : > { %1423 = vrot.lane.b32.xlu1 %v4656_v52, %s4077_s19 }
 0x4f5   : > { %v1412_v57 = vpop.permute.xlu1 %1411  ;;  %v1436_v59 = vpop.permute.xlu0 %1435 }
 0x4f6   : > { %v1459_v60 = vsel %vm1457_vm9, %v1412_v57, %v1436_v59 }
 0x4f7   : > { %v1471_v62 = vsel %vm4663_vm14, %v1459_v60, %v1394_v10  ;;  %v874_v10 = vmul.f32 %v3346_v42, %v4661_v53 }
 0x4f8   : > { %v1599_v61 = vadd.f32 %v4473_v36, %v1471_v62 }
 0x4f9   : > { %vm876_vm15 = vcmp.ne.f32.partialorder %v874_v10, 0.0 }
 0x4fa   : > { %v1748_v35 = vsel %vm876_vm15, %v1599_v61, -10000.0 }
 0x4fb   : > { %v1758_v37 = vsel %vm1059_vm1, %v1748_v35, -inf }
 0x502   : > { %v1416_v19 = vpop.permute.xlu1 %1415  ;;  %v1440_v0 = vpop.permute.xlu0 %1439 }
 0x503   : > { %v1461_v1 = vsel %vm1457_vm9, %v1416_v19, %v1440_v0 }
 0x504   : > { %v1473_v31 = vsel %vm4663_vm14, %v1461_v1, %v1396_v23 }
 0x505   : > { %v1646_v20 = vadd.f32 %v4489_v54, %v1473_v31 }
 0x506   : > { %v1515_v21 = vpop.permute.xlu1 %1514  ;;  %v1491_v2 = vpop.permute.xlu0 %1490 }
 0x507   : > { %v1537_v3 = vsel %vm1534_vm12, %v1491_v2, %v1515_v21  ;;  %v1750_v24 = vsel %vm876_vm15, %v1646_v20, -10000.0 }
 0x508   : > { %v1643_v4 = vadd.f32 %v4481_v49, %v1537_v3  ;;  %v1764_v25 = vsel %vm1059_vm1, %v1750_v24, -inf }
 0x50a   : > { %v1519_v8 = vpop.permute.xlu1 %1518  ;;  %v1495_v9 = vpop.permute.xlu0 %1494  ;;  %v1749_v11 = vsel %vm875_vm13, %v1643_v4, -10000.0 }
 0x50b   : > { %v1539_v36 = vsel %vm1534_vm12, %v1495_v9, %v1519_v8  ;;  %v1761_v15 = vsel %vm1059_vm1, %v1749_v11, -inf }
 0x50c   : > { %v1690_v16 = vadd.f32 %v4483_v50, %v1539_v36  ;;  %1762 = vmax.xlane.f32.xlu0 %v1761_v15 }
 0x50e   : > { %v1751_v49 = vsel %vm875_vm13, %v1690_v16, -10000.0  ;;  %v1523_v26 = vpop.permute.xlu1 %1522  ;;  %v1499_v29 = vpop.permute.xlu0 %1498 }
 0x50f   : > { %v1767_v23 = vsel %vm1059_vm1, %v1751_v49, -inf  ;;  %v1541_v50 = vsel %vm1534_vm12, %v1499_v29, %v1523_v26 }
 0x510   : > { %1768 = vmax.xlane.f32.xlu1 %v1767_v23  ;;  %v1737_v54 = vadd.f32 %v4493_v58, %v1541_v50 }
 0x512   : > { %v1753_v32 = vsel %vm875_vm13, %v1737_v54, -10000.0  ;;  %v1420_v42 = vpop.permute.xlu0 %1419 }
 0x513   : > { %v1773_v33 = vsel %vm1059_vm1, %v1753_v32, -inf }
 0x514   : > { %1765 = vmax.xlane.f32.xlu1 %v1764_v25 }
 0x522   : > { %1447 = vrot.lane.b32.xlu0 %v4656_v52, %s4076_s0  ;;  %s5245_s0 = sld [smem:[#allocation28_spill]] }
 0x528   : > { %s5246_s19 = scalar_lea.vmem %s5245_s0, %s4259_s20 }
 0x541   : > { %1774 = vmax.xlane.f32.xlu0 %v1773_v33 }
 0x545   : > { %1759 = vmax.xlane.f32.xlu0 %v1758_v37 }
 0x54d   : > { %v1757_v12 = vpop.xlane.xlu1 %1756 }
 0x54e   : > { %v1779_v38 = vsub.f32 %v1747_v47, %v1757_v12 }
 0x550   : > { %v1787_v41 = vmul.f32 1.442695, %v1779_v38 }
 0x551   : > { %v1444_v28 = vpop.permute.xlu1 %1443 }
 0x552   : > { %3926 = vpow2.f32 %v1787_v41  ;;  %v1463_v46 = vsel %vm1457_vm9, %v1420_v42, %v1444_v28 }
 0x553   : > { %v1475_v58 = vsel %vm4663_vm14, %v1463_v46, %v4637_v17 }
 0x554   : > { %v1693_v43 = vadd.f32 %v4491_v55, %v1475_v58 }
 0x555   : > { %v1424_v18 = vpop.permute.xlu1 %1423 }
 0x556   : > { %v1752_v48 = vsel %vm876_vm15, %v1693_v43, -10000.0 }
 0x557   : > { %v1770_v22 = vsel %vm1059_vm1, %v1752_v48, -inf }
 0x558   : > { %1771 = vmax.xlane.f32.xlu0 %v1770_v22 }
 0x55c   : > { %v4701_v51 = vpop.eup %3926 }
 0x55d   : > { %v1803_v47 = vsel %vm1059_vm1, %v4701_v51, 0.0 }
 0x55e   : > { %1804 = vadd.xlane.f32.xlu0 %v1803_v47 }
 0x599   : > { %v1763_v34 = vpop.xlane.xlu0 %1762 }
 0x59a   : > { %v1781_v57 = vsub.f32 %v1749_v11, %v1763_v34 }
 0x59c   : > { %v1791_v59 = vmul.f32 1.442695, %v1781_v57 }
 0x59d   : > { %v1769_v60 = vpop.xlane.xlu1 %1768  ;;  %v1448_v62 = vpop.permute.xlu0 %1447 }
 0x59e   : > { %3928 = vpow2.f32 %v1791_v59  ;;  %v1783_v17 = vsub.f32 %v1751_v49, %v1769_v60  ;;  %v1465_v55 = vsel %vm1457_vm9, %v1424_v18, %v1448_v62  ;;  %vm2166_vm9 = vcmask 252928  }
 0x59f   : > { %v1477_v61 = vsel %vm4663_vm14, %v1465_v55, %v4656_v52 }
 0x5a0   : > { %v1795_v19 = vmul.f32 1.442695, %v1783_v17  ;;  %v1740_v0 = vadd.f32 %v4496_v63, %v1477_v61 }
 0x5a1   : > { %v1766_v8 = vpop.xlane.xlu1 %1765 }
 0x5a2   : > { %3930 = vpow2.f32 %v1795_v19  ;;  %v1754_v1 = vsel %vm876_vm15, %v1740_v0, -10000.0  ;;  %v1782_v9 = vsub.f32 %v1750_v24, %v1766_v8 }
 0x5a3   : > { %v1776_v21 = vsel %vm1059_vm1, %v1754_v1, -inf }
 0x5a4   : > { %1777 = vmax.xlane.f32.xlu1 %v1776_v21  ;;  %v1793_v36 = vmul.f32 1.442695, %v1782_v9 }
 0x5a8   : > { %v3929_v2 = vpop.eup %3928 }
 0x5a9   : > { %v1809_v3 = vsel %vm1059_vm1, %v3929_v2, 0.0 }
 0x5aa   : > { %1810 = vadd.xlane.f32.xlu1 %v1809_v3 }
 0x5ac   : > { %v3931_v4 = vpop.eup %3930 }
 0x5ad   : > { %v1815_v31 = vsel %vm1059_vm1, %v3931_v4, 0.0 }
 0x5ae   : > { %1816 = vadd.xlane.f32.xlu0 %v1815_v31 }
 0x5ce   : > { %v1775_v52 = vpop.xlane.xlu0 %1774 }
 0x5cf   : > { %v1785_v11 = vsub.f32 %v1753_v32, %v1775_v52 }
 0x5d1   : > { %v1799_v63 = vmul.f32 1.442695, %v1785_v11 }
 0x5d2   : > { %v1760_v15 = vpop.xlane.xlu0 %1759 }
 0x5d3   : > { %3932 = vpow2.f32 %v1799_v63  ;;  %v1780_v10 = vsub.f32 %v1748_v35, %v1760_v15 }
 0x5d4   : > { %3934 = vpow2.f32 %v1793_v36 }
 0x5d5   : > { %v1789_v16 = vmul.f32 1.442695, %v1780_v10 }
 0x5d7   : > { %3936 = vpow2.f32 %v1789_v16 }
 0x5dd   : > { %v3933_v20 = vpop.eup %3932 }
 0x5de   : > { %v1821_v49 = vsel %vm1059_vm1, %v3933_v20, 0.0  ;;  %v3935_v23 = vpop.eup %3934 }
 0x5df   : > { %1822 = vadd.xlane.f32.xlu1 %v1821_v49  ;;  %v1812_v24 = vsel %vm1059_vm1, %v3935_v23, 0.0 }
 0x5e1   : > { %v3937_v25 = vpop.eup %3936 }
 0x5e2   : > { %v1806_v26 = vsel %vm1059_vm1, %v3937_v25, 0.0 }
 0x5e3   : > { %1807 = vadd.xlane.f32.xlu0 %v1806_v26  ;;  %1813 = vadd.xlane.f32.xlu1 %v1812_v24 }
 0x5e5   : > { %v1772_v29 = vpop.xlane.xlu0 %1771 }
 0x5e6   : > { %v1784_v50 = vsub.f32 %v1752_v48, %v1772_v29 }
 0x5e8   : > { %v1797_v54 = vmul.f32 1.442695, %v1784_v50 }
 0x5ea   : > { %3938 = vpow2.f32 %v1797_v54 }
 0x5eb   : > { %v1805_v35 = vpop.xlane.xlu0 %1804 }
 0x5ec   : > { %3940 = vrcp.f32 %v1805_v35 }
 0x5f4   : > { %v4717_v32 = vpop.eup %3938 }
 0x5f5   : > { %v1818_v33 = vsel %vm1059_vm1, %v4717_v32, 0.0 }
 0x5f6   : > { %1819 = vadd.xlane.f32.xlu0 %v1818_v33  ;;  %v3941_v42 = vpop.eup %3940 }
 0x5f7   : > { %v4723_v58 = vmul.f32 %v3941_v42, %v4701_v51 }
 0x5f9   : > { %v1847_v22 = vsel %vm1059_vm1, %v4723_v58, 0.0 }
 0x631   : > { %v1778_v37 = vpop.xlane.xlu1 %1777 }
 0x632   : > { %v1786_v12 = vsub.f32 %v1754_v1, %v1778_v37 }
 0x634   : > { %v1801_v38 = vmul.f32 1.442695, %v1786_v12 }
 0x636   : > { %3942 = vpow2.f32 %v1801_v38 }
 0x637   : > { %v1811_v41 = vpop.xlane.xlu1 %1810 }
 0x638   : > { %3944 = vrcp.f32 %v1811_v41 }
 0x63b   : > { %v1817_v18 = vpop.xlane.xlu0 %1816 }
 0x63c   : > { %3946 = vrcp.f32 %v1817_v18 }
 0x640   : > { %v3943_v28 = vpop.eup %3942 }
 0x641   : > { %v1824_v46 = vsel %vm1059_vm1, %v3943_v28, 0.0 }
 0x642   : > { %v3945_v43 = vpop.eup %3944  ;;  %1825 = vadd.xlane.f32.xlu1 %v1824_v46 }
 0x643   : > { %v4725_v48 = vmul.f32 %v3945_v43, %v3929_v2 }
 0x645   : > { %v1849_v47 = vsel %vm1059_vm1, %v4725_v48, 0.0 }
 0x646   : > { %v3764_v34 = vpack.i.bf16 %v1849_v47, %v1847_v22  ;;  %v3947_v57 = vpop.eup %3946 }
 0x647   : > { %v4733_v51 = vmul.f32 %v3947_v57, %v3931_v4 }
 0x648   : > { %3765 = vrot.lane.b32.xlu0 %v3764_v34, %s4080_s15 }
 0x649   : > { %v1851_v59 = vsel %vm1059_vm1, %v4733_v51, 0.0 }
 0x653   : > { %1887 = vrot.lane.b32.xlu1 %v1847_v22, %s4081_s6 }
 0x657   : > { %1891 = vrot.lane.b32.xlu1 %v1849_v47, %s4081_s6 }
 0x65b   : > { %1895 = vrot.lane.b32.xlu1 %v1851_v59, %s4081_s6 }
 0x66c   : > { %v1823_v60 = vpop.xlane.xlu1 %1822 }
 0x66d   : > { %3948 = vrcp.f32 %v1823_v60 }
 0x670   : > { %v1808_v62 = vpop.xlane.xlu0 %1807  ;;  %v1814_v17 = vpop.xlane.xlu1 %1813 }
 0x671   : > { %3950 = vrcp.f32 %v1808_v62 }
 0x672   : > { %3952 = vrcp.f32 %v1814_v17 }
 0x677   : > { %v3949_v55 = vpop.eup %3948 }
 0x678   : > { %v4739_v61 = vmul.f32 %v3949_v55, %v3933_v20 }
 0x67a   : > { %v1853_v19 = vsel %vm1059_vm1, %v4739_v61, 0.0 }
 0x67b   : > { %v3951_v0 = vpop.eup %3950  ;;  %v3769_v1 = vpack.i.bf16 %v1853_v19, %v1851_v59 }
 0x67c   : > { %v3953_v21 = vpop.eup %3952  ;;  %v4743_v2 = vmul.f32 %v3951_v0, %v3937_v25 }
 0x67d   : > { %3770 = vrot.lane.b32.xlu0 %v3769_v1, %s4080_s15  ;;  %v4746_v3 = vmul.f32 %v3953_v21, %v3935_v23 }
 0x67e   : > { %v1848_v4 = vsel %vm1059_vm1, %v4743_v2, 0.0 }
 0x67f   : > { %v1850_v31 = vsel %vm1059_vm1, %v4746_v3, 0.0  ;;  %v1844_v8 = vpack.c.bf16 %v4746_v3, %v4725_v48 }
 0x680   : > { %v3774_v9 = vpack.i.bf16 %v1850_v31, %v1848_v4 }
 0x681   : > { %1899 = vrot.lane.b32.xlu0 %v1853_v19, %s4081_s6 }
 0x682   : > { %3775 = vrot.lane.b32.xlu1 %v3774_v9, %s4080_s15 }
 0x683   : > { %v1820_v52 = vpop.xlane.xlu0 %1819 }
 0x684   : > { %3954 = vrcp.f32 %v1820_v52 }
 0x685   : > { %3780 = vrot.lane.b32.xlu0 %v3774_v9, %s4081_s6 }
 0x68e   : > { %v3955_v10 = vpop.eup %3954 }
 0x68f   : > { %v4764_v24 = vmul.f32 %v3955_v10, %v4717_v32 }
 0x691   : > { %v1852_v33 = vsel %vm1059_vm1, %v4764_v24, 0.0 }
 0x6ba   : > { %v3766_v36 = vpop.permute.xlu0 %3765 }
 0x6bb   : > { %v3767_v15 = vunpack.i.l.bf16 %v3766_v36  ;;  %v3768_v16 = vunpack.i.h.bf16 %v3766_v36 }
 0x6cf   : > { %v1826_v11 = vpop.xlane.xlu1 %1825 }
 0x6d0   : > { %3956 = vrcp.f32 %v1826_v11 }
 0x6d3   : > { %v1888_v63 = vpop.permute.xlu1 %1887 }
 0x6d4   : > { %v1912_v20 = vsel %vm1911_vm0, %v3767_v15, %v1888_v63 }
 0x6d5   : > { %v1920_v25 = vsel %vm4461_vm5, %v1912_v20, %v1847_v22 }
 0x6d7   : > { %v1892_v49 = vpop.permute.xlu1 %1891 }
 0x6d8   : > { %v1914_v23 = vsel %vm1911_vm0, %v3768_v16, %v1892_v49 }
 0x6d9   : > { %v1922_v26 = vsel %vm4461_vm5, %v1914_v23, %v1849_v47 }
 0x6da   : > { %v3957_v29 = vpop.eup %3956  ;;  %v3794_v50 = vpack.i.bf16 %v1922_v26, %v1920_v25 }
 0x6db   : > { %v4766_v54 = vmul.f32 %v3957_v29, %v3943_v28  ;;  %v1896_v38 = vpop.permute.xlu1 %1895 }
 0x6dc   : > { %3795 = vrot.lane.b32.xlu0 %v3794_v50, %s4082_s29  ;;  %3785 = vrot.lane.b32.xlu1 %v3794_v50, %s4083_s30 }
 0x6dd   : > { %v1854_v35 = vsel %vm1059_vm1, %v4766_v54, 0.0 }
 0x6de   : > { %v3799_v37 = vpack.i.bf16 %v1854_v35, %v1852_v33 }
 0x6e0   : > { %3800 = vrot.lane.b32.xlu0 %v3799_v37, %s4081_s6  ;;  %3790 = vrot.lane.b32.xlu1 %v3799_v37, %s4080_s15 }
 0x6ef   : > { %v3771_v32 = vpop.permute.xlu0 %3770 }
 0x6f0   : > { %v3772_v12 = vunpack.i.l.bf16 %v3771_v32  ;;  %v3773_v41 = vunpack.i.h.bf16 %v3771_v32 }
 0x6f2   : > { %v1916_v42 = vsel %vm1911_vm0, %v3772_v12, %v1896_v38 }
 0x6f3   : > { %v1900_v28 = vpop.permute.xlu0 %1899  ;;  %v1924_v46 = vsel %vm4461_vm5, %v1916_v42, %v1851_v59 }
 0x6f4   : > { %v1918_v43 = vsel %vm1911_vm0, %v3773_v41, %v1900_v28  ;;  %1968 = vrot.lane.b32.xlu0 %v1924_v46, %s4082_s29  ;;  %v3776_v47 = vpop.permute.xlu1 %3775 }
 0x6f5   : > { %v1926_v22 = vsel %vm4461_vm5, %v1918_v43, %v1853_v19  ;;  %v3778_v57 = vunpack.i.h.bf16 %v3776_v47  ;;  %v3777_v60 = vunpack.i.l.bf16 %v3776_v47  ;;  %vm2170_vm5 = vcmask 1046528  }
 0x6f6   : > { %v3804_v18 = vpack.i.bf16 %v1926_v22, %v1924_v46 }
 0x6f7   : > { %v3781_v34 = vpop.permute.xlu0 %3780 }
 0x6f8   : > { %v3783_v62 = vunpack.i.h.bf16 %v3781_v34  ;;  %v3782_v17 = vunpack.i.l.bf16 %v3781_v34  ;;  %3805 = vrot.lane.b32.xlu1 %v3804_v18, %s4083_s30 }
 0x6fa   : > { %v1913_v55 = vsel %vm1911_vm0, %v3777_v60, %v3782_v17  ;;  %v1915_v59 = vsel %vm1911_vm0, %v3778_v57, %v3783_v62 }
 0x6fb   : > { %v1921_v0 = vsel %vm4559_vm8, %v1913_v55, %v1848_v4  ;;  %v1923_v30 = vsel %vm4559_vm8, %v1915_v59, %v1850_v31 }
 0x6fc   : > { %1972 = vrot.lane.b32.xlu1 %v1926_v22, %s4082_s29  ;;  %v3809_v19 = vpack.i.bf16 %v1923_v30, %v1921_v0 }
 0x6fe   : > { %3810 = vrot.lane.b32.xlu0 %v3809_v19, %s4083_s30 }
 0x700   : > { %3815 = vrot.lane.b32.xlu1 %v3809_v19, %s4082_s29  ;;  %v4847_v19 = vld [vmem:[%s4307_s16] sm:$0xff]  }
 0x701   : > { %3538 = vmatpush3.bf16.msra.mxu0 %v4847_v19  ;;  %3546 = vmatpush3.bf16.msra.mxu1 %v4847_v19 }
 0x702   : > { %3539 = vmatprep.subr.bf16.mxu0 %v4066_v13  ;;  %3547 = vmatprep.subr.bf16.mxu1 %v4066_v13 }
 0x74e   : > { %v3796_v1 = vpop.permute.xlu0 %3795  ;;  %v3786_v21 = vpop.permute.xlu1 %3785 }
 0x74f   : > { %v3798_v9 = vunpack.i.h.bf16 %v3796_v1  ;;  %v3797_v52 = vunpack.i.l.bf16 %v3796_v1  ;;  %v3788_v11 = vunpack.i.h.bf16 %v3786_v21  ;;  %v3787_v36 = vunpack.i.l.bf16 %v3786_v21 }
 0x751   : > { %v1987_v63 = vsel %vm1984_vm4, %v3788_v11, %v3798_v9  ;;  %v1985_v4 = vsel %vm1984_vm4, %v3787_v36, %v3797_v52 }
 0x752   : > { %v4797_v31 = vsel %vm4512_vm7, %v1987_v63, %v1922_v26  ;;  %v4801_v15 = vsel %vm4512_vm7, %v1985_v4, %v1920_v25  ;;  %v3801_v10 = vpop.permute.xlu0 %3800  ;;  %v3791_v16 = vpop.permute.xlu1 %3790 }
 0x753   : > { %v3803_v20 = vunpack.i.h.bf16 %v3801_v10  ;;  %v3802_v49 = vunpack.i.l.bf16 %v3801_v10  ;;  %v3793_v23 = vunpack.i.h.bf16 %v3791_v16  ;;  %v3792_v29 = vunpack.i.l.bf16 %v3791_v16 }
 0x754   : > { %v3829_v50 = vpack.i.bf16 %v4797_v31, %v4801_v15 }
 0x755   : > { %v1919_v37 = vsel %vm1911_vm0, %v3793_v23, %v3803_v20  ;;  %v1917_v32 = vsel %vm1911_vm0, %v3792_v29, %v3802_v49 }
 0x756   : > { %v4809_v26 = vsel %vm4559_vm8, %v1919_v37, %v1854_v35  ;;  %v4813_v25 = vsel %vm4559_vm8, %v1917_v32, %v1852_v33  ;;  %3830 = vrot.lane.b32.xlu1 %v3829_v50, %s4084_s26  ;;  %3820 = vrot.lane.b32.xlu0 %v3829_v50, %s4085_s1  ;;  %vm2130_vm8 = vcmask 64512  }
 0x757   : > { %v3834_v12 = vpack.i.bf16 %v4809_v26, %v4813_v25 }
 0x75a   : > { %3835 = vrot.lane.b32.xlu1 %v3834_v12, %s4082_s29  ;;  %3825 = vrot.lane.b32.xlu0 %v3834_v12, %s4083_s30 }
 0x766   : > { %v1969_v41 = vpop.permute.xlu0 %1968 }
 0x76a   : > { %v3806_v38 = vpop.permute.xlu1 %3805 }
 0x76b   : > { %v3807_v35 = vunpack.i.l.bf16 %v3806_v38  ;;  %v3808_v42 = vunpack.i.h.bf16 %v3806_v38 }
 0x76d   : > { %v1989_v27 = vsel %vm1984_vm4, %v3807_v35, %v1969_v41 }
 0x76e   : > { %v1973_v33 = vpop.permute.xlu1 %1972  ;;  %v4824_v28 = vsel %vm4512_vm7, %v1989_v27, %v1924_v46 }
 0x76f   : > { %v1991_v43 = vsel %vm1984_vm4, %v3808_v42, %v1973_v33  ;;  %2041 = vrot.lane.b32.xlu1 %v4824_v28, %s4084_s26 }
 0x770   : > { %v4831_v47 = vsel %vm4512_vm7, %v1991_v43, %v1926_v22  ;;  %v3811_v18 = vpop.permute.xlu0 %3810  ;;  %vm2057_vm7 = vcmask 31744  }
 0x771   : > { %v3839_v34 = vpack.i.bf16 %v4831_v47, %v4824_v28  ;;  %v3813_v60 = vunpack.i.h.bf16 %v3811_v18  ;;  %v3812_v62 = vunpack.i.l.bf16 %v3811_v18 }
 0x772   : > { %v3816_v57 = vpop.permute.xlu1 %3815 }
 0x773   : > { %v3818_v17 = vunpack.i.h.bf16 %v3816_v57  ;;  %v3817_v46 = vunpack.i.l.bf16 %v3816_v57  ;;  %3840 = vrot.lane.b32.xlu0 %v3839_v34, %s4085_s1 }
 0x775   : > { %v1986_v55 = vsel %vm1984_vm4, %v3812_v62, %v3817_v46  ;;  %v1988_v59 = vsel %vm1984_vm4, %v3813_v60, %v3818_v17 }
 0x776   : > { %v4840_v7 = vsel %vm4600_vm11, %v1986_v55, %v1921_v0  ;;  %v4844_v22 = vsel %vm4600_vm11, %v1988_v59, %v1923_v30  ;;  %v3909_v0 = vld [vmem:[%s4307_s16 + $0x8] sm:$0xff]   ;;  %v4086_v30 = vmov 65535   ;;  %s4087_s16 = smov 8  }
 0x777   : > { %2045 = vrot.lane.b32.xlu0 %v4831_v47, %s4084_s26  ;;  %v3844_v1 = vpack.i.bf16 %v4844_v22, %v4840_v7  ;;  %v2172_v21 = vsel %vm2170_vm5, 4294967295, %v4086_v30 }
 0x778   : > { %v2173_v9 = vsel %vm2171_vm6, %v2172_v21, 0 }
 0x779   : > { %3845 = vrot.lane.b32.xlu1 %v3844_v1, %s4085_s1  ;;  %v4860_v52 = vand.u32 %v3909_v0, %v2173_v9 }
 0x77b   : > { %3850 = vrot.lane.b32.xlu0 %v3844_v1, %s4084_s26  ;;  %3540 = vmatpush3.bf16.msra.mxu0 %v4860_v52 }
 0x77c   : > { %3548 = vmatpush3.bf16.msra.mxu1 %v4860_v52  ;;  %3553 = vmatprep.subr.bf16.mxu0 %v4066_v13 }
 0x77d   : > { %3561 = vmatprep.subr.bf16.mxu1 %v4066_v13 }
 0x7c8   : > { %v3831_v11 = vpop.permute.xlu1 %3830  ;;  %v3821_v36 = vpop.permute.xlu0 %3820 }
 0x7c9   : > { %v3833_v63 = vunpack.i.h.bf16 %v3831_v11  ;;  %v3832_v4 = vunpack.i.l.bf16 %v3831_v11  ;;  %v3823_v10 = vunpack.i.h.bf16 %v3821_v36  ;;  %v3822_v16 = vunpack.i.l.bf16 %v3821_v36 }
 0x7cb   : > { %v2060_v20 = vsel %vm2057_vm7, %v3823_v10, %v3833_v63  ;;  %v2058_v49 = vsel %vm2057_vm7, %v3822_v16, %v3832_v4 }
 0x7cc   : > { %v3836_v23 = vpop.permute.xlu1 %3835  ;;  %v3826_v29 = vpop.permute.xlu0 %3825  ;;  %v2066_v50 = vsel %vm4576_vm10, %v2058_v49, %v4801_v15  ;;  %v2068_v37 = vsel %vm4576_vm10, %v2060_v20, %v4797_v31 }
 0x7cd   : > { %v3838_v32 = vunpack.i.h.bf16 %v3836_v23  ;;  %v3837_v12 = vunpack.i.l.bf16 %v3836_v23  ;;  %v3828_v38 = vunpack.i.h.bf16 %v3826_v29  ;;  %v3827_v35 = vunpack.i.l.bf16 %v3826_v29 }
 0x7ce   : > { %v3864_v41 = vpack.i.bf16 %v2068_v37, %v2066_v50 }
 0x7cf   : > { %v1992_v42 = vsel %vm1984_vm4, %v3828_v38, %v3838_v32  ;;  %v1990_v27 = vsel %vm1984_vm4, %v3827_v35, %v3837_v12 }
 0x7d0   : > { %v4879_v33 = vsel %vm4600_vm11, %v1992_v42, %v4809_v26  ;;  %v4884_v15 = vsel %vm4600_vm11, %v1990_v27, %v4813_v25  ;;  %3865 = vrot.lane.b32.xlu0 %v3864_v41, %s4087_s16  ;;  %3855 = vrot.lane.b32.xlu1 %v3864_v41, %s4088_s23 }
 0x7d1   : > { %v3869_v31 = vpack.i.bf16 %v4879_v33, %v4884_v15 }
 0x7d4   : > { %3870 = vrot.lane.b32.xlu0 %v3869_v31, %s4084_s26  ;;  %3860 = vrot.lane.b32.xlu1 %v3869_v31, %s4085_s1 }
 0x7e1   : > { %v2042_v18 = vpop.permute.xlu1 %2041 }
 0x7e5   : > { %v3841_v43 = vpop.permute.xlu0 %3840 }
 0x7e6   : > { %v3842_v26 = vunpack.i.l.bf16 %v3841_v43  ;;  %v3843_v34 = vunpack.i.h.bf16 %v3841_v43 }
 0x7e8   : > { %v2062_v6 = vsel %vm2057_vm7, %v3842_v26, %v2042_v18 }
 0x7e9   : > { %v2046_v25 = vpop.permute.xlu0 %2045  ;;  %v2070_v57 = vsel %vm4576_vm10, %v2062_v6, %v4824_v28 }
 0x7ea   : > { %v2064_v60 = vsel %vm2057_vm7, %v3843_v34, %v2046_v25  ;;  %2114 = vrot.lane.b32.xlu0 %v2070_v57, %s4087_s16 }
 0x7eb   : > { %v2072_v62 = vsel %vm4576_vm10, %v2064_v60, %v4831_v47  ;;  %v3846_v46 = vpop.permute.xlu1 %3845 }
 0x7ec   : > { %v3874_v17 = vpack.i.bf16 %v2072_v62, %v2070_v57  ;;  %v3848_v1 = vunpack.i.h.bf16 %v3846_v46  ;;  %v3847_v5 = vunpack.i.l.bf16 %v3846_v46  ;;  %v1846_v46 = vpack.c.bf16 %v4766_v54, %v4739_v61 }
 0x7ed   : > { %v3851_v28 = vpop.permute.xlu0 %3850 }
 0x7ee   : > { %3880 = vrot.lane.b32.xlu0 %v4394_v44, %s4069_s8  ;;  %3875 = vrot.lane.b32.xlu1 %v3874_v17, %s4088_s23  ;;  %v3853_v55 = vunpack.i.h.bf16 %v3851_v28  ;;  %v3852_v59 = vunpack.i.l.bf16 %v3851_v28 }
 0x7f0   : > { %v2059_v47 = vsel %vm2057_vm7, %v3847_v5, %v3852_v59  ;;  %v2061_v0 = vsel %vm2057_vm7, %v3848_v1, %v3853_v55 }
 0x7f1   : > { %v2067_v4 = vsel %vm4663_vm14, %v2059_v47, %v4840_v7  ;;  %v2069_v10 = vsel %vm4663_vm14, %v2061_v0, %v4844_v22 }
 0x7f2   : > { %3890 = vrot.lane.b32.xlu0 %v4394_v44, %s4070_s27  ;;  %2118 = vrot.lane.b32.xlu1 %v2072_v62, %s4087_s16  ;;  %v1843_v62 = vpack.c.bf16 %v4743_v2, %v4723_v58  ;;  %v1845_v2 = vpack.c.bf16 %v4764_v24, %v4733_v51 }
 0x7f6   : > { %3885 = vrot.lane.b32.xlu1 %v4394_v44, %s4068_s3  ;;  %s5244_s3 = sld [smem:[#allocation21_spill]] }
 0x7fc   : > { %v3910_v58 = vld [vmem:[%s5244_s3] sm:$0xff]   ;;  %v3911_v28 = vld [vmem:[%s5244_s3 + $0x8] sm:$0xff]   ;;  %v3913_v1 = vld [vmem:[%s5244_s3 + $0x18] sm:$0xff]  }
 0x842   : > { %v3866_v30 = vpop.permute.xlu0 %3865  ;;  %v3856_v21 = vpop.permute.xlu1 %3855 }
 0x843   : > { %v3868_v9 = vunpack.i.h.bf16 %v3866_v30  ;;  %v3867_v11 = vunpack.i.l.bf16 %v3866_v30  ;;  %v3858_v36 = vunpack.i.h.bf16 %v3856_v21  ;;  %v3857_v63 = vunpack.i.l.bf16 %v3856_v21 }
 0x845   : > { %v2133_v44 = vsel %vm2130_vm8, %v3858_v36, %v3868_v9  ;;  %v2131_v16 = vsel %vm2130_vm8, %v3857_v63, %v3867_v11 }
 0x846   : > { %v2147_v20 = vpack.c.bf16 %v2067_v4, %v2131_v16  ;;  %v2148_v49 = vpack.c.bf16 %v2069_v10, %v2133_v44  ;;  %v3871_v7 = vpop.permute.xlu0 %3870  ;;  %v3861_v22 = vpop.permute.xlu1 %3860 }
 0x847   : > { %v3862_v23 = vunpack.i.l.bf16 %v3861_v22  ;;  %v3873_v50 = vunpack.i.h.bf16 %v3871_v7  ;;  %v3863_v37 = vunpack.i.h.bf16 %v3861_v22 }
 0x848   : > { %3542 = vmatmul.mubr.msk.bf16.vlgmr.msra.gmra.mrb[20].mxu0 %vm2166_vm9, %v2147_v20  ;;  %3550 = vmatmul.mubr.msk.bf16.vlgmr.msra.gmra.mrb[16].mxu1 %vm2166_vm9, %v2148_v49 }
 0x849   : > { %3554 = vmatpush3.bf16.msra.mxu0 %v4847_v19  ;;  %3562 = vmatpush3.bf16.msra.mxu1 %v4847_v19  ;;  %v3872_v19 = vunpack.i.l.bf16 %v3871_v7  ;;  %v2065_v41 = vsel %vm2057_vm7, %v3863_v37, %v3873_v50 }
 0x84a   : > { %3555 = vmatprep.subr.bf16.mxu0 %v4066_v13  ;;  %3563 = vmatprep.subr.bf16.mxu1 %v4066_v13  ;;  %v2073_v34 = vsel %vm4663_vm14, %v2065_v41, %v4879_v33 }
 0x84b   : > { %3557 = vmatprep.mubr.msk.bf16.mxu0 %vm4067_vm3, %v4066_v13  ;;  %3565 = vmatprep.mubr.msk.bf16.mxu1 %vm4067_vm3, %v4066_v13  ;;  %v2063_v32 = vsel %vm2057_vm7, %v3862_v23, %v3872_v19 }
 0x84d   : > { %3556 = vmatpush3.bf16.msra.mxu0 %v4860_v52  ;;  %3564 = vmatpush3.bf16.msra.mxu1 %v4860_v52  ;;  %v2071_v52 = vsel %vm4663_vm14, %v2063_v32, %v4884_v15 }
 0x84e   : > { %3569 = vmatprep.subr.bf16.mxu0 %v4066_v13  ;;  %3575 = vmatprep.subr.bf16.mxu1 %v4066_v13 }
 0x85c   : > { %v2115_v29 = vpop.permute.xlu0 %2114 }
 0x860   : > { %v3881_v12 = vpop.permute.xlu0 %3880  ;;  %v3876_v38 = vpop.permute.xlu1 %3875 }
 0x861   : > { %v3877_v35 = vunpack.i.l.bf16 %v3876_v38  ;;  %v3883_v42 = vunpack.i.h.bf16 %v3881_v12  ;;  %v3882_v27 = vunpack.i.l.bf16 %v3881_v12  ;;  %v3878_v31 = vunpack.i.h.bf16 %v3876_v38 }
 0x863   : > { %v2135_v43 = vsel %vm2130_vm8, %v3877_v35, %v2115_v29  ;;  %v1042_v57 = vpack.c.bf16 %v3883_v42, %v3882_v27 }
 0x864   : > { %v2149_v26 = vpack.c.bf16 %v2071_v52, %v2135_v43  ;;  %v2119_v18 = vpop.permute.xlu1 %2118  ;;  %v3891_v15 = vpop.permute.xlu0 %3890 }
 0x865   : > { %v2137_v6 = vsel %vm2130_vm8, %v3878_v31, %v2119_v18  ;;  %v3893_v39 = vunpack.i.h.bf16 %v3891_v15  ;;  %v3892_v40 = vunpack.i.l.bf16 %v3891_v15 }
 0x866   : > { %v2150_v25 = vpack.c.bf16 %v2073_v34, %v2137_v6  ;;  %3558 = vmatmul.mubr.msk.bf16.vlgmr.msra.gmra.mrb[24].mxu0 %vm2166_vm9, %v2149_v26  ;;  %v3384_v34 = vld [vmem:[%s5246_s19] ss:$0 sm:$0xff] }
 0x867   : > { %3570 = vmatpush3.bf16.msra.mxu0 %v1041_v45  ;;  %3571 = vmatprep.mubr.msk.bf16.mxu0 %vm4067_vm3, %v4066_v13  ;;  %v1044_v17 = vpack.c.bf16 %v3893_v39, %v3892_v40 }
 0x868   : > { %v3886_v60 = vpop.permute.xlu1 %3885  ;;  %3566 = vmatmul.mubr.msk.bf16.vlgmr.msra.gmra.mrb[20].mxu1 %vm2166_vm9, %v2150_v25  ;;  %3581 = vmatprep.subr.bf16.mxu0 %v4066_v13 }
 0x869   : > { %v3888_v56 = vunpack.i.h.bf16 %v3886_v60  ;;  %v3887_v33 = vunpack.i.l.bf16 %v3886_v60  ;;  %3576 = vmatpush3.bf16.msra.mxu1 %v1042_v57  ;;  %3577 = vmatprep.mubr.msk.bf16.mxu1 %vm4067_vm3, %v4066_v13 }
 0x86a   : > { %3587 = vmatprep.subr.bf16.mxu1 %v4066_v13 }
 0x86b   : > { %v1043_v45 = vpack.c.bf16 %v3888_v56, %v3887_v33 }
 0x86e   : > { %3572 = vmatmul.mubr.msk.bf16.vlgmr.msra.gmra.mrb[20].mxu0 %vm1059_vm1, %v1843_v62  ;;  %v3966_v62 = vld [vmem:[#allocation2] sm:$0xff] }
 0x86f   : > { %3582 = vmatpush3.bf16.msra.mxu0 %v1043_v45  ;;  %3583 = vmatprep.mubr.msk.bf16.mxu0 %vm4067_vm3, %v4066_v13 }
 0x870   : > { %3578 = vmatmul.mubr.msk.bf16.vlgmr.msra.gmra.mrb[16].mxu1 %vm1059_vm1, %v1844_v8  ;;  %3593 = vmatprep.subr.bf16.mxu0 %v4066_v13  ;;  %v3912_v8 = vld [vmem:[%s5244_s3 + $0x10] sm:$0xff]   ;;  %s5253_s3 = sld [smem:[#allocation9_spill]] }
 0x871   : > { %3588 = vmatpush3.bf16.msra.mxu1 %v1044_v17  ;;  %3589 = vmatprep.mubr.msk.bf16.mxu1 %vm4067_vm3, %v4066_v13 }
 0x872   : > { %3599 = vmatprep.subr.bf16.mxu1 %v4066_v13 }
 0x876   : > { %3584 = vmatmul.mubr.msk.bf16.vlgmr.msra.gmra.mrb[24].mxu0 %vm1059_vm1, %v1845_v2  ;;  %v3967_v2 = vld [vmem:[#allocation2 + $0x8] sm:$0xff]  ;;  %p3404_p1 = scmp.ne.s32.totalorder %s5253_s3, 1 }
 0x877   : > { %3594 = vmatpush3.bf16.msra.mxu0 %v3910_v58  ;;  %3595 = vmatprep.mubr.msk.bf16.mxu0 %vm4067_vm3, %v4066_v13 }
 0x878   : > { %3590 = vmatmul.mubr.msk.bf16.vlgmr.msra.gmra.mrb[20].mxu1 %vm1059_vm1, %v1846_v46  ;;  %3605 = vmatprep.subr.bf16.mxu0 %v4066_v13 }
 0x879   : > { %3600 = vmatpush3.bf16.msra.mxu1 %v3911_v28  ;;  %3601 = vmatprep.mubr.msk.bf16.mxu1 %vm4067_vm3, %v4066_v13 }
 0x87a   : > { %3611 = vmatprep.subr.bf16.mxu1 %v4066_v13 }
 0x941   : > { %v2387_v48 = vpop.f32.mrb[20].mxu0 }
 0x942   : > { %v3573_v51 = vpop.f32.mrb[21].mxu0 }
 0x943   : > { %v2390_v61 = vpop.f32.mrb[22].mxu0  ;;  %v2431_v3 = vpop.f32.mrb[16].mxu1 }
 0x944   : > { %v2526_v24 = vpack.c.bf16 %v2390_v61, %v2387_v48  ;;  %v3574_v54 = vpop.f32.mrb[23].mxu0  ;;  %v3579_v55 = vpop.f32.mrb[17].mxu1 }
 0x945   : > { %v2434_v59 = vpop.f32.mrb[18].mxu1 }
 0x946   : > { %v2527_v5 = vpack.c.bf16 %v2434_v59, %v2431_v3  ;;  %v3580_v47 = vpop.f32.mrb[19].mxu1  ;;  %3596 = vmatmul.mubr.msk.bf16.vlgmr.msra.gmra.mrb[28].mxu0 %vm1059_vm1, %v2526_v24 }
 0x947   : > { %3606 = vmatpush3.bf16.msra.mxu0 %v3912_v8  ;;  %3607 = vmatprep.mubr.msk.bf16.mxu0 %vm4067_vm3, %v4066_v13  ;;  %v3915_v47 = vld [vmem:[%s4328_s24 + $0x8] sm:$0xff]  }
 0x948   : > { %3602 = vmatmul.mubr.msk.bf16.vlgmr.msra.gmra.mrb[24].mxu1 %vm1059_vm1, %v2527_v5  ;;  %3617 = vmatprep.subr.bf16.mxu0 %v4066_v13  ;;  %v3914_v5 = vld [vmem:[%s4328_s24] sm:$0xff]  }
 0x949   : > { %3612 = vmatpush3.bf16.msra.mxu1 %v3913_v1  ;;  %v2475_v0 = vpop.f32.mrb[24].mxu0  ;;  %3613 = vmatprep.mubr.msk.bf16.mxu1 %vm4067_vm3, %v4066_v13 }
 0x94a   : > { %v3585_v30 = vpop.f32.mrb[25].mxu0  ;;  %3629 = vmatprep.subr.bf16.mxu1 %v4066_v13 }
 0x94b   : > { %v2478_v21 = vpop.f32.mrb[26].mxu0  ;;  %v2519_v9 = vpop.f32.mrb[20].mxu1  ;;  %v3917_v30 = vld [vmem:[%s4328_s24 + $0x18] sm:$0xff]  }
 0x94c   : > { %v2528_v11 = vpack.c.bf16 %v2478_v21, %v2475_v0  ;;  %v3586_v36 = vpop.f32.mrb[27].mxu0  ;;  %v3591_v63 = vpop.f32.mrb[21].mxu1  ;;  %v3916_v0 = vld [vmem:[%s4328_s24 + $0x10] sm:$0xff]   ;;  %v3918_v21 = vld [vmem:[%s4337_s25] sm:$0xff]  }
 0x94d   : > { %v2522_v44 = vpop.f32.mrb[22].mxu1  ;;  %v3921_v36 = vld [vmem:[%s4337_s25 + $0x18] sm:$0xff]   ;;  %v3922_v63 = vld [vmem:[%s4337_s25 + $0x20] sm:$0xff]  }
 0x94e   : > { %v2529_v4 = vpack.c.bf16 %v2522_v44, %v2519_v9  ;;  %v3592_v10 = vpop.f32.mrb[23].mxu1  ;;  %3608 = vmatmul.mubr.msk.bf16.vlgmr.msra.gmra.mrb[32].mxu0 %vm1059_vm1, %v2528_v11  ;;  %v3919_v9 = vld [vmem:[%s4337_s25 + $0x8] sm:$0xff]   ;;  %v3920_v11 = vld [vmem:[%s4337_s25 + $0x10] sm:$0xff]  }
 0x94f   : > { %3625 = vmatprep.mubr.msk.bf16.mxu0 %vm4067_vm3, %v4066_v13  ;;  %3618 = vmatpush3.bf16.msra.mxu0 %v3914_v5  ;;  %v3923_v44 = vld [vmem:[%s4337_s25 + $0x28] sm:$0xff]  }
 0x950   : > { %3614 = vmatmul.mubr.msk.bf16.vlgmr.msra.gmra.mrb[28].mxu1 %vm1059_vm1, %v2529_v4  ;;  %3619 = vmatprep.subr.bf16.mxu0 %v4066_v13 }
 0x951   : > { %3645 = vmatprep.mubr.msk.bf16.mxu1 %vm4067_vm3, %v4066_v13  ;;  %3630 = vmatpush3.bf16.msra.mxu1 %v3918_v21 }
 0x952   : > { %3631 = vmatprep.subr.bf16.mxu1 %v4066_v13 }
 0x953   : > { %3620 = vmatpush3.bf16.msra.mxu0 %v3915_v47 }
 0x954   : > { %3621 = vmatprep.subr.bf16.mxu0 %v4066_v13 }
 0x955   : > { %3632 = vmatpush3.bf16.msra.mxu1 %v3919_v9 }
 0x956   : > { %3633 = vmatprep.subr.bf16.mxu1 %v4066_v13 }
 0x957   : > { %3622 = vmatpush3.bf16.msra.mxu0 %v3916_v0 }
 0x958   : > { %3623 = vmatprep.subr.bf16.mxu0 %v4066_v13 }
 0x959   : > { %3634 = vmatpush3.bf16.msra.mxu1 %v3920_v11 }
 0x95a   : > { %3635 = vmatprep.subr.bf16.mxu1 %v4066_v13 }
 0x95b   : > { %3624 = vmatpush3.bf16.msra.mxu0 %v3917_v30 }
 0x95d   : > { %3636 = vmatpush3.bf16.msra.mxu1 %v3921_v36 }
 0x95e   : > { %3637 = vmatprep.subr.bf16.mxu1 %v4066_v13 }
 0x961   : > { %3638 = vmatpush3.bf16.msra.mxu1 %v3922_v63 }
 0x962   : > { %3639 = vmatprep.subr.bf16.mxu1 %v4066_v13 }
 0x965   : > { %3640 = vmatpush3.bf16.msra.mxu1 %v3923_v44 }
 0x966   : > { %3641 = vmatprep.subr.bf16.mxu1 %v4066_v13 }
 0xa19   : > { %v2581_v16 = vpop.f32.mrb[28].mxu0 }
 0xa1a   : > { %v3597_v20 = vpop.f32.mrb[29].mxu0  ;;  %v2738_v22 = vsel %vm938_vm2, %v2581_v16, 0.0 }
 0xa1b   : > { %v2584_v49 = vpop.f32.mrb[30].mxu0  ;;  %v2631_v7 = vpop.f32.mrb[24].mxu1 }
 0xa1c   : > { %v2739_v19 = vsel %vm938_vm2, %v2631_v7, 0.0  ;;  %v3598_v23 = vpop.f32.mrb[31].mxu0  ;;  %v3603_v29 = vpop.f32.mrb[25].mxu1  ;;  %v2745_v32 = vsel %vm938_vm2, %v2584_v49, 0.0 }
 0xa1d   : > { %v2740_v50 = vadd.f32 %v2739_v19, %v2738_v22  ;;  %v2634_v37 = vpop.f32.mrb[26].mxu1  ;;  %v3385_v19 = vld [vmem:[%s5247_s18] ss:$0 sm:$0xff] }
 0xa1e   : > { %v2746_v12 = vsel %vm938_vm2, %v2634_v37, 0.0  ;;  %v3604_v38 = vpop.f32.mrb[27].mxu1 }
 0xa1f   : > { %v2747_v35 = vadd.f32 %v2746_v12, %v2745_v32 }
 0xa21   : > { %v2681_v52 = vpop.f32.mrb[32].mxu0 }
 0xa22   : > { %v2741_v41 = vsel %vm938_vm2, %v2681_v52, 0.0  ;;  %v3609_v42 = vpop.f32.mrb[33].mxu0 }
 0xa23   : > { %v2742_v27 = vadd.f32 %v2741_v41, %v2740_v50  ;;  %v2684_v31 = vpop.f32.mrb[34].mxu0  ;;  %v2731_v43 = vpop.f32.mrb[28].mxu1  ;;  %v3386_v50 = vld [vmem:[%s5248_s22] ss:$0 sm:$0xff] }
 0xa24   : > { %v2748_v26 = vsel %vm938_vm2, %v2684_v31, 0.0  ;;  %v2743_v18 = vsel %vm938_vm2, %v2731_v43, 0.0  ;;  %v3610_v6 = vpop.f32.mrb[35].mxu0  ;;  %v3615_v25 = vpop.f32.mrb[29].mxu1  ;;  %v3925_v31 = vld [vmem:[%s4337_s25 + $0x38] sm:$0xff]  }
 0xa25   : > { %v2749_v57 = vadd.f32 %v2748_v26, %v2747_v35  ;;  %v2744_v15 = vadd.f32 %v2743_v18, %v2742_v27  ;;  %v2734_v60 = vpop.f32.mrb[30].mxu1  ;;  %v3924_v27 = vld [vmem:[%s4337_s25 + $0x30] sm:$0xff]   ;;  %v3387_v43 = vld [vmem:[%s819_s2] ss:$0 sm:$0xff]  ;;  %s5251_s25 = sld [smem:[#allocation31_spill]] }
 0xa26   : > { %v2750_v56 = vsel %vm938_vm2, %v2734_v60, 0.0  ;;  %v3616_v33 = vpop.f32.mrb[31].mxu1  ;;  %3642 = vmatpush3.bf16.msra.mxu1 %v3924_v27 }
 0xa27   : > { %v2759_v39 = vadd.f32 %v3384_v34, %v2744_v15  ;;  %v2751_v40 = vadd.f32 %v2750_v56, %v2749_v57  ;;  %3643 = vmatprep.subr.bf16.mxu1 %v4066_v13  ;;  %v3393_v13 = vld [vmem:[%s827_s11] ss:$0 sm:$0xff] }
 0xa29   : > { %v2760_v45 = vadd.f32 %v3384_v34, %v2751_v40  ;;  %v2761_v17 = vadd.f32 %v3966_v62, %v2759_v39 }
 0xa2a   : > { %3644 = vmatpush3.bf16.msra.mxu1 %v3925_v31 }
 0xa2b   : > { %v2765_v58 = vsel %vm938_vm2, %v2761_v17, 0.0  ;;  %v2762_v28 = vadd.f32 %v3967_v2, %v2760_v45  ;;  %s5252_s26 = scalar_lea.vmem %s5251_s25, %s4259_s20 }
 0xa2c   : > { %2766 = vadd.xlane.f32.xlu1 %v2765_v58  ;;  %v3402_v44 = vld [vmem:[%s5252_s26] ss:$0 sm:$0xff] }
 0xa2d   : > { %v2768_v46 = vsel %vm938_vm2, %v2762_v28, 0.0 }
 0xa2e   : > { %2769 = vadd.xlane.f32.xlu0 %v2768_v46 }
 0xab9   : > { %v2767_v48 = vpop.xlane.xlu1 %2766 }
 0xaba   : > { %v2772_v51 = vmul.f32 0.015625, %v2767_v48 }
 0xabb   : > { %v2770_v61 = vpop.xlane.xlu0 %2769 }
 0xabc   : > { %v2774_v3 = vsub.f32 %v2761_v17, %v2772_v51  ;;  %v2773_v8 = vmul.f32 0.015625, %v2770_v61 }
 0xabe   : > { %v2775_v24 = vsub.f32 %v2762_v28, %v2773_v8  ;;  %v2776_v54 = vmul.f32 %v2774_v3, %v2774_v3 }
 0xac0   : > { %v2778_v55 = vsel %vm938_vm2, %v2776_v54, 0.0  ;;  %v2777_v59 = vmul.f32 %v2775_v24, %v2775_v24 }
 0xac1   : > { %2779 = vadd.xlane.f32.xlu0 %v2778_v55 }
 0xac2   : > { %v2781_v1 = vsel %vm938_vm2, %v2777_v59, 0.0 }
 0xac3   : > { %2782 = vadd.xlane.f32.xlu1 %v2781_v1 }
 0xb4e   : > { %v2780_v4 = vpop.xlane.xlu0 %2779 }
 0xb4f   : > { %v2784_v10 = vmul.f32 0.015625, %v2780_v4 }
 0xb50   : > { %v2783_v16 = vpop.xlane.xlu1 %2782 }
 0xb51   : > { %v2786_v20 = vadd.f32 1e-05, %v2784_v10  ;;  %v2785_v49 = vmul.f32 0.015625, %v2783_v16  ;;  %v3403_v16 = vld [vmem:[%s811_s7] ss:$0 sm:$0xff] }
 0xb53   : > { %3958 = vrsqrt.f32 %v2786_v20  ;;  %v2787_v7 = vadd.f32 1e-05, %v2785_v49 }
 0xb55   : > { %3960 = vrsqrt.f32 %v2787_v7 }
 0xb5d   : > { %v3959_v22 = vpop.eup %3958 }
 0xb5e   : > { %v2790_v23 = vmul.f32 %v3959_v22, %v2774_v3 }
 0xb5f   : > { %v3961_v29 = vpop.eup %3960 }
 0xb60   : > { %v2798_v37 = vmul.f32 %v3385_v19, %v2790_v23  ;;  %v2791_v32 = vmul.f32 %v3961_v29, %v2775_v24 }
 0xb62   : > { %v2799_v12 = vmul.f32 %v3385_v19, %v2791_v32  ;;  %v2806_v38 = vadd.f32 %v3386_v50, %v2798_v37 }
 0xb64   : > { %v2807_v35 = vadd.f32 %v3386_v50, %v2799_v12  ;;  %v2808_v52 = vmul.f32 %v2806_v38, %v4609_v14 }
 0xb66   : > { %v2809_v41 = vmul.f32 %v2807_v35, %v4661_v53 }
 0xb68   : > { %v2810_v42 = vpack.c.bf16 %v2809_v41, %v2808_v52 }
 0xb6a   : > { %3626 = vmatmul.mubr.msk.bf16.vlgmr.msra.gmra.mrb[36].mxu0 %vm938_vm2, %v2810_v42 }
 0xc3d   : > { %v2887_v26 = vpop.f32.mrb[36].mxu0 }
 0xc3e   : > { %v2888_v18 = vadd.f32 %v3387_v43, %v2887_v26  ;;  %v3627_v34 = vpop.f32.mrb[37].mxu0 }
 0xc3f   : > { %v2890_v6 = vpop.f32.mrb[38].mxu0 }
 0xc40   : > { %v2891_v25 = vadd.f32 %v3387_v43, %v2890_v6  ;;  %v3628_v57 = vpop.f32.mrb[39].mxu0  ;;  %v2894_v15 = vmax.f32 %v2888_v18, 0.0 }
 0xc42   : > { %v2895_v60 = vmax.f32 %v2891_v25, 0.0 }
 0xc44   : > { %v2896_v56 = vpack.c.bf16 %v2895_v60, %v2894_v15 }
 0xc46   : > { %3646 = vmatmul.mubr.bf16.vlgmr.msra.gmra.mrb[32].mxu1 %v2896_v56 }
 0xd19   : > { %v3002_v33 = vpop.f32.mrb[32].mxu1 }
 0xd1a   : > { %v3003_v39 = vadd.f32 %v3393_v13, %v3002_v33  ;;  %v3647_v40 = vpop.f32.mrb[33].mxu1 }
 0xd1b   : > { %v3005_v45 = vpop.f32.mrb[34].mxu1 }
 0xd1c   : > { %v3009_v62 = vmul.f32 %v3003_v39, %v4609_v14  ;;  %v3006_v17 = vadd.f32 %v3393_v13, %v3005_v45  ;;  %v3648_v58 = vpop.f32.mrb[35].mxu1 }
 0xd1e   : > { %v3010_v2 = vmul.f32 %v3006_v17, %v4661_v53  ;;  %v3011_v28 = vadd.f32 %v3009_v62, %v2806_v38 }
 0xd20   : > { %v3015_v46 = vsel %vm938_vm2, %v3011_v28, 0.0  ;;  %v3012_v48 = vadd.f32 %v3010_v2, %v2807_v35 }
 0xd21   : > { %3016 = vadd.xlane.f32.xlu0 %v3015_v46 }
 0xd22   : > { %v3018_v51 = vsel %vm938_vm2, %v3012_v48, 0.0 }
 0xd23   : > { %3019 = vadd.xlane.f32.xlu1 %v3018_v51 }
 0xdae   : > { %v3017_v61 = vpop.xlane.xlu0 %3016 }
 0xdaf   : > { %v3021_v3 = vmul.f32 0.015625, %v3017_v61 }
 0xdb0   : > { %v3020_v8 = vpop.xlane.xlu1 %3019 }
 0xdb1   : > { %v3023_v24 = vsub.f32 %v3011_v28, %v3021_v3  ;;  %v3022_v54 = vmul.f32 0.015625, %v3020_v8 }
 0xdb3   : > { %v3024_v55 = vsub.f32 %v3012_v48, %v3022_v54  ;;  %v3025_v59 = vmul.f32 %v3023_v24, %v3023_v24 }
 0xdb5   : > { %v3027_v1 = vsel %vm938_vm2, %v3025_v59, 0.0  ;;  %v3026_v5 = vmul.f32 %v3024_v55, %v3024_v55 }
 0xdb6   : > { %3028 = vadd.xlane.f32.xlu0 %v3027_v1 }
 0xdb7   : > { %v3030_v47 = vsel %vm938_vm2, %v3026_v5, 0.0 }
 0xdb8   : > { %3031 = vadd.xlane.f32.xlu1 %v3030_v47 }
 0xe43   : > { %v3029_v0 = vpop.xlane.xlu0 %3028 }
 0xe44   : > { %v3033_v30 = vmul.f32 0.015625, %v3029_v0 }
 0xe45   : > { %v3032_v21 = vpop.xlane.xlu1 %3031 }
 0xe46   : > { %v3035_v9 = vadd.f32 1e-05, %v3033_v30  ;;  %v3034_v11 = vmul.f32 0.015625, %v3032_v21 }
 0xe48   : > { %3962 = vrsqrt.f32 %v3035_v9  ;;  %v3036_v36 = vadd.f32 1e-05, %v3034_v11 }
 0xe4a   : > { %3964 = vrsqrt.f32 %v3036_v36 }
 0xe52   : > { %v3963_v63 = vpop.eup %3962 }
 0xe53   : > { %v3039_v4 = vmul.f32 %v3963_v63, %v3023_v24 }
 0xe54   : > { %v3965_v10 = vpop.eup %3964 }
 0xe55   : > { %v3047_v20 = vmul.f32 %v3402_v44, %v3039_v4  ;;  %v3040_v49 = vmul.f32 %v3965_v10, %v3024_v55  ;;  %3062 = sbr.rel (%p3404_p1) target bundleno = 3678 (0xe5e), region = 96 }
 0xe57   : > { %v3055_v7 = vadd.f32 %v3403_v16, %v3047_v20  ;;  %v3048_v22 = vmul.f32 %v3402_v44, %v3040_v49 }
 0xe59   : > { %3057 = vst.msk [vmem:[#allocation2] sm:$0xff] %vm938_vm2, %v3055_v7  ;;  %v3056_v19 = vadd.f32 %v3403_v16, %v3048_v22  ;;  %v3063_v23 = vmul.f32 (!%p3404_p1), %v3055_v7, %v4609_v14 }
 0xe5b   : > { %3058 = vst.msk [vmem:[#allocation2 + $0x8] sm:$0xff] %vm938_vm2, %v3056_v19  ;;  %v3064_v29 = vmul.f32 (!%p3404_p1), %v3056_v19, %v4661_v53  ;;  %3065 = vst.msk [vmem:[%s4343_s14] sm:$0xff] (!%p3404_p1), %vm938_vm2, %v3063_v23 }
 0xe5d   : > { %3066 = vst.msk [vmem:[%s4343_s14 + $0x8] sm:$0xff] %vm938_vm2, %v3064_v29 }
 0xe5e PF: > { %s5254_s7 = sld [smem:[#allocation10_spill]]  ;;  %s5255_s20 = sld [smem:[#allocation7_spill]] }
 0xe5f   : > { %s5257_s24 = sld [smem:[#allocation35_spill]]  ;;  %s3081_s28 = sshll.u32 %s4343_s14, 4  ;;  %s5089_s28 = int_to_ptr.vmem [resolvable:$true] %s3081_s28 }
 0xe60   : > { %s3968_s5 = scalar_lea.vmem %s5089_s28, 256  ;;  %s4089_s21 = smov [#allocation3]  }
 0xe61   : > { %p3969_p2 = scmp.ne.s32.totalorder %s5089_s28, %s3968_s5  ;;  %s3972_s15 = sshll.u32 %s4089_s21, 4  ;;  %s3973_s15 = int_to_ptr.vmem [resolvable:$false] %s3972_s15 }
 0xe62   : > { %s3974_s6 = scalar_lea.vmem %s3973_s15, 512  ;;  %p3975_p6 = scmp.lt.s32.totalorder %s5089_s28, %s3973_s15 }
 0xe63   : > { %p3970_p4 = pnand %p3969_p2, %p4230_p3  ;;  %p3976_p7 = scmp.lt.s32.totalorder %s3974_s6, %s3968_s5 }
 0xe64   : > { %s3418_s27 = sshll.u32 %s5254_s7, 8  ;;  %s5259_s17 = sand.u32 1, %s5255_s20  }
 0xe65   : > { %s5258_s4 = smov %s5257_s24  ;;  %s5086_s18 = scalar_lea.hbm %s5257_s24, %s3418_s27 }
 0xe66   : > { %s5093_s22 = scalar_lea.sflag [#allocation4], %s5259_s17  ;;  %p3971_p5 = pneg %p3970_p4 }
 0xe67   : > { %p3977_p8 = por %p3976_p7, %p3975_p6 }
 0xe69   : > { %p3978_p10 = pnand %p3977_p8, %p3971_p5 }
 0xe6b   : > { %3981 = shalt.err (!%p3978_p10)
}
 0xe6c   : > { %s3982_s14 = scalar_lea.hbm %s5086_s18, 256  ;;  %s3986_s11 = scalar_lea.hbm %s5258_s4, 512 }
 0xe6d   : > { %p3983_p11 = scmp.ne.s32.totalorder %s5086_s18, %s3982_s14  ;;  %p3987_p0 = scmp.lt.u32.totalorder %s5086_s18, %s5258_s4 }
 0xe6e   : > { %p3988_p1 = scmp.lt.u32.totalorder %s3986_s11, %s3982_s14  ;;  %p3990_p4 = scmp.lt.u32.totalorder %s3982_s14, %s5086_s18 }
 0xe6f   : > { %p3984_p12 = pnand %p3983_p11, %p4230_p3 }
 0xe70   : > { %p3989_p2 = por %p3988_p1, %p3987_p0 }
 0xe71   : > { %p3985_p13 = pneg %p3984_p12 }
 0xe72   : > { %p3991_p5 = por %p3990_p4, %p3989_p2 }
 0xe74   : > { %p3992_p6 = pnand %p3991_p5, %p3985_p13 }
 0xe76   : > { %3995 = shalt.err (!%p3992_p6)
}
 0xe77   : > { %s4090_s26 = smov 128  }
 0xe78   : > { %3665 = dma.vmem_to_hbm [thread:$0]  (%p4230_p3), %s5089_s28, 256, %s5086_s18, %s5093_s22, %s4090_s26, %s4090_s26, %s4087_s16  }
 0xe79 PF: > { %s5260_s1 = sld [smem:[#allocation13_spill]]  ;;  %s5261_s23 = sld [smem:[#allocation6_spill]] }
 0xe7f   : > { %p3671_p7 = scmp.ge.s32.totalorder %s5260_s1, 2  ;;  %s3096_s7 = sand.u32 1, %s5261_s23  }
 0xe80   : > { %s3097_s20 = scalar_lea.sflag [#allocation4], %s3096_s7 }
 0xe81   : > { %p3668_p8 = pnand %p3671_p7, %p4240_p9 }
 0xe83   : > { %4029 = dma.done.wait (!%p3668_p8), %s3097_s20, 256  }
 0xe84   : > { %4031 = vsyncadd (!%p3668_p8), %s3097_s20, 4294967040  ;;  %s30_s30 = sadd.s32 1, %s5260_s1   ;;  %s5263_s24 = sld [smem:[#allocation7_spill]] }
 0xe85   : > { %p27_p10 = scmp.ge.s32.totalorder %s30_s30, 6   ;;  %s5264_s25 = sld [smem:[#allocation8_spill]] }
 0xe86   : > { %s5265_s26 = sld [smem:[#allocation18_spill]]  ;;  %s5266_s27 = sld [smem:[#allocation11_spill]] }
 0xe87   : > { %s5267_s28 = sld [smem:[#allocation12_spill]]  ;;  %s5268_s29 = sld [smem:[#allocation14_spill]] }
 0xe88   : > { %s5269_s0 = sld [smem:[#allocation16_spill]]  ;;  %29 = sbr.rel (!%p27_p10) target bundleno = 20 (0x14), region = 179 }
 0xe8f   :  { %3102 = vsyncpa [#allocation4], 1 }
 0xe90   :  { %3104 = vsyncpa [#allocation4 + $0x1], 1 }

</bundles_post_ra>
